<compile_context>
chip_gen: v6e
topology: v6e:2x2x1
jax: 0.10.0
libtpu: 0.0.40
codegen_flags: <defaults>
</compile_context>

<pallas_src>
import functools
import math

import numpy as np

import jax
import jax.numpy as jnp
from jax import lax
from jax.experimental import pallas as pl
from jax.experimental.pallas import tpu as pltpu


# ---------------------------------------------------------------------------
# Fused SPNASInitBlock kernel (one grid step == B_BLK batch elements)
# ---------------------------------------------------------------------------
def _init_block_kernel(patches_ref, mask_ref, ws_ref, bs_ref, wd_ref, bd_ref,
                       wp_ref, bp_ref, o_ref, *, row_stride):
    """Fused: stem 3x3/s2 conv+BN+ReLU -> dw3x3/s1 conv+BN+ReLU -> 1x1 conv+BN.

    patches_ref : (B, Kp, Lp)    bf16  im2col'd stem patches in flat halo coords
    mask_ref    : (1, Lp)        f32   1.0 at interior positions, 0.0 at halo/tail
    ws_ref      : (Cmid, Kp)     bf16  stem weight, BN scale folded in
    bs_ref      : (Cmid, 1)      f32   stem BN shift
    wd_ref      : (Cmid, 9)      f32   depthwise taps (t = di*3+dj), BN scale folded
    bd_ref      : (Cmid, 1)      f32   depthwise BN shift
    wp_ref      : (Cout, Cmid)   bf16  pointwise weight, BN scale folded in
    bp_ref      : (Cout, 1)      f32   pointwise BN shift
    o_ref       : (B, Cout, Lout) f32  output in flat (Hp, Wp) coords, top-left valid
    """
    b_blk = patches_ref.shape[0]
    lout = o_ref.shape[2]

    mask = mask_ref[...]
    ws = ws_ref[...]
    wd = wd_ref[...]
    wp = wp_ref[...]
    bs = bs_ref[...]
    bd = bd_ref[...]
    bp = bp_ref[...]

    for b in range(b_blk):                                   # static unroll (B_BLK small)
        # --- stem 3x3/s2 conv (im2col'd) on the MXU; BN scale already in ws.
        y = jnp.dot(ws, patches_ref[b], preferred_element_type=jnp.float32)
        # shift + ReLU; mask zeroes the depthwise halo and the lane-tail positions,
        # so mid is the zero-padded stem output, flat with row stride `row_stride`.
        mid = mask * jnp.maximum(y + bs, 0.0)                # (Cmid, Lp) f32, in vregs

        # --- depthwise 3x3 / stride 1: 9 multiply-adds of lane-shifted views of the
        # flat mid (shift work lands on XLU lane rotates; no sublane misalignment).
        acc = jnp.zeros((mid.shape[0], lout), jnp.float32)
        for di in range(3):
            for dj in range(3):
                off = di * row_stride + dj
                t = di * 3 + dj
                acc = acc + wd[:, t:t + 1] * mid[:, off:off + lout]
        dwv = jnp.maximum(acc + bd, 0.0).astype(jnp.bfloat16)  # (Cmid, Lout)

        # --- pointwise 1x1 conv on the MXU + BN shift (no activation); lane-dense store.
        out = jnp.dot(wp, dwv, preferred_element_type=jnp.float32) + bp
        o_ref[b] = out.astype(o_ref.dtype)


# ---------------------------------------------------------------------------
# Wrapper: NCHW in/out, channel-major im2col glue, single fused pallas_call
# ---------------------------------------------------------------------------
def spnas_init_block_forward(params, x_nchw, *, batch_block=8):
    x = x_nchw.astype(jnp.float32)
    N, Cin, H, W = x.shape
    Cmid = params["w_stem_cm"].shape[0]
    Kp = params["w_stem_cm"].shape[1]
    Cout = params["w_pw_cm"].shape[0]
    Kraw = 9 * Cin

    k, s, p = 3, 2, 1
    Ho = (H + 2 * p - k) // s + 1
    Wo = (W + 2 * p - k) // s + 1
    Hp, Wp = Ho + 2, Wo + 2                    # dw-halo-padded mid grid
    Lmid = Hp * Wp                             # flat spatial extent (halo included)
    Lout = Lmid                                # kernel output lane width
    # per-image lane width: leave room for the max depthwise read offset (2*Wp+2)
    Lp = ((Lmid + 2 * Wp + 2 + 127) // 128) * 128

    # --- stem im2col, built directly in the channel-major, halo-embedded flat layout
    # the kernel consumes (thin XLA glue on a few tens of KB).
    xp = jnp.pad(x, ((0, 0), (0, 0), (p, p), (p, p)))
    cols = [xp[:, :, di:di + s * Ho:s, dj:dj + s * Wo:s]
            for di in range(k) for dj in range(k)]           # 9 x (N, Cin, Ho, Wo)
    pat = jnp.stack(cols, axis=1).reshape(N, Kraw, Ho, Wo)   # k = (di*3+dj)*Cin + cin
    pat = jnp.pad(pat, ((0, 0), (0, 0), (1, 1), (1, 1)))     # embed dw halo -> (Hp, Wp)
    pat = pat.reshape(N, Kraw, Lmid)
    pat = jnp.pad(pat, ((0, 0), (0, Kp - Kraw), (0, Lp - Lmid)))
    patches = pat.astype(jnp.bfloat16)                       # (N, Kp, Lp)

    # validity mask over the flat mid coordinate (1.0 at the Ho*Wo interior positions)
    m2 = np.zeros((Hp, Wp), np.float32)
    m2[1:1 + Ho, 1:1 + Wo] = 1.0
    mask_np = np.zeros((1, Lp), np.float32)
    mask_np[0, :Lmid] = m2.reshape(-1)
    mask = jnp.asarray(mask_np)

    # fold the batch into one (or few) grid steps
    B = min(batch_block, N)
    n_blocks = -(-N // B)
    Npad = n_blocks * B
    if Npad != N:
        patches = jnp.pad(patches, ((0, Npad - N), (0, 0), (0, 0)))

    kernel = functools.partial(_init_block_kernel, row_stride=Wp)
    out = pl.pallas_call(
        kernel,
        grid=(n_blocks,),
        in_specs=[
            pl.BlockSpec((B, Kp, Lp), lambda g: (g, 0, 0)),      # per-step patch slab
            pl.BlockSpec((1, Lp), lambda g: (0, 0)),
            pl.BlockSpec((Cmid, Kp), lambda g: (0, 0)),
            pl.BlockSpec((Cmid, 1), lambda g: (0, 0)),
            pl.BlockSpec((Cmid, 9), lambda g: (0, 0)),
            pl.BlockSpec((Cmid, 1), lambda g: (0, 0)),
            pl.BlockSpec((Cout, Cmid), lambda g: (0, 0)),
            pl.BlockSpec((Cout, 1), lambda g: (0, 0)),
        ],
        out_specs=pl.BlockSpec((B, Cout, Lout), lambda g: (g, 0, 0)),
        out_shape=jax.ShapeDtypeStruct((Npad, Cout, Lout), jnp.float32),
        compiler_params=pltpu.CompilerParams(
            dimension_semantics=("parallel",),        # independent batch blocks
            vmem_limit_bytes=4 * 1024 * 1024,         # right-sized (actual need << 1 MiB)
        ),
    )(patches, mask, params["w_stem_cm"], params["b_stem"],
      params["w_dw_cm"], params["b_dw"], params["w_pw_cm"], params["b_pw"])

    # NCHW comes out directly: free reshape + tiny boundary slice (no transpose).
    out = out.reshape(Npad, Cout, Hp, Wp)[:N, :, :Ho, :Wo]
    return out


# ---------------------------------------------------------------------------
# Parameter construction (mirrors PyTorch __init__ shapes; BN folded at setup)
# ---------------------------------------------------------------------------
class KeyGen:
    def __init__(self, key):
        self.key = key

    def __call__(self):
        self.key, sub = jax.random.split(self.key)
        return sub


def _kaiming_uniform(key, shape, fan_in):
    bound = math.sqrt(6.0 / fan_in)
    return jax.random.uniform(key, shape, jnp.float32, -bound, bound)


def _make_bn(kg, c):
    gamma = jax.random.uniform(kg(), (c,), jnp.float32, 0.8, 1.2)
    beta = jax.random.uniform(kg(), (c,), jnp.float32, -0.1, 0.1)
    mean = jax.random.uniform(kg(), (c,), jnp.float32, -0.1, 0.1)
    var = jax.random.uniform(kg(), (c,), jnp.float32, 0.5, 1.5)
    scale = gamma / jnp.sqrt(var + 1e-5)
    shift = beta - mean * scale
    return scale, shift


def make_spnas_init_block(key, in_channels, out_channels, mid_channels):
    kg = KeyGen(key)
    # conv3x3_block (stride 2): weight (3,3,Cin,Cmid); im2col row order (di,dj,cin).
    w_stem = _kaiming_uniform(kg(), (3, 3, in_channels, mid_channels),
                              fan_in=9 * in_channels)
    s1, b1 = _make_bn(kg, mid_channels)
    # SPNASUnit(exp_factor=1, use_kernel3=True, stride=1, use_skip=False):
    w_dw = _kaiming_uniform(kg(), (3, 3, mid_channels), fan_in=9)      # depthwise
    s2, b2 = _make_bn(kg, mid_channels)
    w_pw = _kaiming_uniform(kg(), (mid_channels, out_channels), fan_in=mid_channels)
    s3, b3 = _make_bn(kg, out_channels)

    # Fold BN scale into the conv weights (bf16 for the MXU operands; note this
    # quantizes scale*W in bf16 -- the reference below mirrors the same rounding).
    Kraw = 9 * in_channels
    Kp = ((Kraw + 31) // 32) * 32
    ws = w_stem.reshape(Kraw, mid_channels) * s1[None, :]
    ws = jnp.pad(ws, ((0, Kp - Kraw), (0, 0)))

    return dict(
        w_stem_cm=ws.T.astype(jnp.bfloat16),                           # (Cmid, Kp)
        b_stem=b1.reshape(-1, 1),                                      # (Cmid, 1)
        w_dw_cm=(w_dw.reshape(9, mid_channels) * s2[None, :]).T,       # (Cmid, 9) f32
        b_dw=b2.reshape(-1, 1),                                        # (Cmid, 1)
        w_pw_cm=(w_pw * s3[None, :]).T.astype(jnp.bfloat16),           # (Cout, Cmid)
        b_pw=b3.reshape(-1, 1),                                        # (Cout, 1)
    )


# ---------------------------------------------------------------------------
# Pure-XLA reference mirroring the kernel's bf16-operand / f32-accumulate math
# ---------------------------------------------------------------------------
def spnas_init_block_reference(params, x_nchw):
    x = x_nchw.astype(jnp.float32)
    N, Cin, H, W = x.shape
    Cmid = params["w_stem_cm"].shape[0]
    Kraw = 9 * Cin

    xb = jnp.transpose(x, (0, 2, 3, 1)).astype(jnp.bfloat16).astype(jnp.float32)
    ws = params["w_stem_cm"].astype(jnp.float32)[:, :Kraw].T.reshape(3, 3, Cin, Cmid)
    y = lax.conv_general_dilated(
        xb, ws, window_strides=(2, 2), padding=((1, 1), (1, 1)),
        dimension_numbers=("NHWC", "HWIO", "NHWC"),
        precision=lax.Precision.HIGHEST)
    y = jnp.maximum(y + params["b_stem"].reshape(-1), 0.0)

    wd = params["w_dw_cm"].astype(jnp.float32).T.reshape(3, 3, 1, Cmid)
    z = lax.conv_general_dilated(
        y, wd, window_strides=(1, 1), padding=((1, 1), (1, 1)),
        dimension_numbers=("NHWC", "HWIO", "NHWC"),
        feature_group_count=Cmid, precision=lax.Precision.HIGHEST)
    z = jnp.maximum(z + params["b_dw"].reshape(-1), 0.0)

    zb = z.astype(jnp.bfloat16).astype(jnp.float32)
    wpm = params["w_pw_cm"].astype(jnp.float32)                        # (Cout, Cmid)
    o = jnp.einsum("nhwc,dc->nhwd", zb, wpm, precision=lax.Precision.HIGHEST)
    o = o + params["b_pw"].reshape(-1)
    return jnp.transpose(o, (0, 3, 1, 2))


# ---------------------------------------------------------------------------
if __name__ == "__main__":
    # SPNASInitBlock(in_channels=3, out_channels=16, mid_channels=32), 32x32 input.
    in_channels, mid_channels, out_channels = 3, 32, 16
    N, H, W = 2, 32, 32

    root = jax.random.PRNGKey(0)
    k_params, k_x = jax.random.split(root)
    params = make_spnas_init_block(k_params, in_channels, out_channels, mid_channels)
    x = jax.random.normal(k_x, (N, in_channels, H, W), jnp.float32)    # NCHW input

    fwd = jax.jit(spnas_init_block_forward)
    y = jax.block_until_ready(fwd(params, x))
    assert y.shape == (N, out_channels, H // 2, W // 2), y.shape
    assert bool(jnp.all(jnp.isfinite(y)))

    # Numerics check (reference mirrors the kernel's bf16/f32 arithmetic, so the
    # tolerance only needs to cover accumulation-order differences).
    y_ref = jax.block_until_ready(spnas_init_block_reference(params, x))
    max_err = float(jnp.max(jnp.abs(y - y_ref)))
    assert max_err < 1e-1, f"max abs err vs reference: {max_err}"

    print("KERNEL_OK")
</pallas_src>

<mosaic_0001>
module attributes {stable_mosaic.version = 11 : i64} {
  func.func @_init_block_kernel(%arg0: i32, %arg1: memref<2x32x384xbf16, #tpu.memory_space<vmem>>, %arg2: memref<1x384xf32, #tpu.memory_space<vmem>>, %arg3: memref<32x32xbf16, #tpu.memory_space<vmem>>, %arg4: memref<32x1xf32, #tpu.memory_space<vmem>>, %arg5: memref<32x9xf32, #tpu.memory_space<vmem>>, %arg6: memref<32x1xf32, #tpu.memory_space<vmem>>, %arg7: memref<16x32xbf16, #tpu.memory_space<vmem>>, %arg8: memref<16x1xf32, #tpu.memory_space<vmem>>, %arg9: memref<2x16x324xf32, #tpu.memory_space<vmem>>) attributes {dimension_semantics = [#tpu.dimension_semantics<parallel>], iteration_bounds = array<i64: 1>, scalar_prefetch = 0 : i64, scratch_operands = 0 : i64, tpu.core_type = #tpu.core_type<tc>, window_params = [{transform_indices = @transform_0, window_bounds = array<i64: 2, 32, 384>}, {pipeline_mode = #tpu.pipeline_mode<synchronous>, transform_indices = @transform_1, window_bounds = array<i64: 1, 384>}, {pipeline_mode = #tpu.pipeline_mode<synchronous>, transform_indices = @transform_2, window_bounds = array<i64: 32, 32>}, {pipeline_mode = #tpu.pipeline_mode<synchronous>, transform_indices = @transform_3, window_bounds = array<i64: 32, 1>}, {pipeline_mode = #tpu.pipeline_mode<synchronous>, transform_indices = @transform_4, window_bounds = array<i64: 32, 9>}, {pipeline_mode = #tpu.pipeline_mode<synchronous>, transform_indices = @transform_5, window_bounds = array<i64: 32, 1>}, {pipeline_mode = #tpu.pipeline_mode<synchronous>, transform_indices = @transform_6, window_bounds = array<i64: 16, 32>}, {pipeline_mode = #tpu.pipeline_mode<synchronous>, transform_indices = @transform_7, window_bounds = array<i64: 16, 1>}, {transform_indices = @transform_8, window_bounds = array<i64: 2, 16, 324>}]} {
    %c0 = arith.constant 0 : index
    %c0_0 = arith.constant 0 : index
    %0 = vector.load %arg2[%c0, %c0_0] : memref<1x384xf32, #tpu.memory_space<vmem>>, vector<1x384xf32>
    %c0_1 = arith.constant 0 : index
    %c0_2 = arith.constant 0 : index
    %1 = vector.load %arg3[%c0_1, %c0_2] : memref<32x32xbf16, #tpu.memory_space<vmem>>, vector<32x32xbf16>
    %c0_3 = arith.constant 0 : index
    %c0_4 = arith.constant 0 : index
    %2 = vector.load %arg5[%c0_3, %c0_4] : memref<32x9xf32, #tpu.memory_space<vmem>>, vector<32x9xf32>
    %c0_5 = arith.constant 0 : index
    %c0_6 = arith.constant 0 : index
    %3 = vector.load %arg7[%c0_5, %c0_6] : memref<16x32xbf16, #tpu.memory_space<vmem>>, vector<16x32xbf16>
    %c0_7 = arith.constant 0 : index
    %c0_8 = arith.constant 0 : index
    %4 = vector.load %arg4[%c0_7, %c0_8] : memref<32x1xf32, #tpu.memory_space<vmem>>, vector<32x1xf32>
    %c0_9 = arith.constant 0 : index
    %c0_10 = arith.constant 0 : index
    %5 = vector.load %arg6[%c0_9, %c0_10] : memref<32x1xf32, #tpu.memory_space<vmem>>, vector<32x1xf32>
    %c0_11 = arith.constant 0 : index
    %c0_12 = arith.constant 0 : index
    %6 = vector.load %arg8[%c0_11, %c0_12] : memref<16x1xf32, #tpu.memory_space<vmem>>, vector<16x1xf32>
    %c0_13 = arith.constant 0 : index
    %c0_14 = arith.constant 0 : index
    %c0_15 = arith.constant 0 : index
    %7 = vector.load %arg1[%c0_13, %c0_14, %c0_15] : memref<2x32x384xbf16, #tpu.memory_space<vmem>>, vector<1x32x384xbf16>
    %8 = vector.shape_cast %7 : vector<1x32x384xbf16> to vector<32x384xbf16>
    %cst = arith.constant dense<0.000000e+00> : vector<32x384xf32>
    %9 = tpu.matmul %1, %8, %cst {dimension_numbers = #tpu.dot_dimension_numbers<[1], [0], [0], [1], [0, 0, 1, 1], [], []>} : vector<32x32xbf16>, vector<32x384xbf16>, vector<32x384xf32> -> vector<32x384xf32>
    %10 = vector.broadcast %4 : vector<32x1xf32> to vector<32x384xf32>
    %11 = arith.addf %9, %10 : vector<32x384xf32>
    %cst_16 = arith.constant 0.000000e+00 : f32
    %12 = vector.broadcast %cst_16 : f32 to vector<32x384xf32>
    %13 = arith.maximumf %11, %12 : vector<32x384xf32>
    %14 = vector.broadcast %0 : vector<1x384xf32> to vector<32x384xf32>
    %15 = arith.mulf %14, %13 : vector<32x384xf32>
    %cst_17 = arith.constant 0.000000e+00 : f32
    %16 = vector.broadcast %cst_17 : f32 to vector<32x324xf32>
    %17 = vector.extract_strided_slice %2 {offsets = [0, 0], sizes = [32, 1], strides = [1, 1]} : vector<32x9xf32> to vector<32x1xf32>
    %18 = vector.extract_strided_slice %15 {offsets = [0, 0], sizes = [32, 324], strides = [1, 1]} : vector<32x384xf32> to vector<32x324xf32>
    %19 = vector.broadcast %17 : vector<32x1xf32> to vector<32x324xf32>
    %20 = arith.mulf %19, %18 : vector<32x324xf32>
    %21 = arith.addf %16, %20 : vector<32x324xf32>
    %22 = vector.extract_strided_slice %2 {offsets = [0, 1], sizes = [32, 1], strides = [1, 1]} : vector<32x9xf32> to vector<32x1xf32>
    %23 = vector.extract_strided_slice %15 {offsets = [0, 1], sizes = [32, 324], strides = [1, 1]} : vector<32x384xf32> to vector<32x324xf32>
    %24 = vector.broadcast %22 : vector<32x1xf32> to vector<32x324xf32>
    %25 = arith.mulf %24, %23 : vector<32x324xf32>
    %26 = arith.addf %21, %25 : vector<32x324xf32>
    %27 = vector.extract_strided_slice %2 {offsets = [0, 2], sizes = [32, 1], strides = [1, 1]} : vector<32x9xf32> to vector<32x1xf32>
    %28 = vector.extract_strided_slice %15 {offsets = [0, 2], sizes = [32, 324], strides = [1, 1]} : vector<32x384xf32> to vector<32x324xf32>
    %29 = vector.broadcast %27 : vector<32x1xf32> to vector<32x324xf32>
    %30 = arith.mulf %29, %28 : vector<32x324xf32>
    %31 = arith.addf %26, %30 : vector<32x324xf32>
    %32 = vector.extract_strided_slice %2 {offsets = [0, 3], sizes = [32, 1], strides = [1, 1]} : vector<32x9xf32> to vector<32x1xf32>
    %33 = vector.extract_strided_slice %15 {offsets = [0, 18], sizes = [32, 324], strides = [1, 1]} : vector<32x384xf32> to vector<32x324xf32>
    %34 = vector.broadcast %32 : vector<32x1xf32> to vector<32x324xf32>
    %35 = arith.mulf %34, %33 : vector<32x324xf32>
    %36 = arith.addf %31, %35 : vector<32x324xf32>
    %37 = vector.extract_strided_slice %2 {offsets = [0, 4], sizes = [32, 1], strides = [1, 1]} : vector<32x9xf32> to vector<32x1xf32>
    %38 = vector.extract_strided_slice %15 {offsets = [0, 19], sizes = [32, 324], strides = [1, 1]} : vector<32x384xf32> to vector<32x324xf32>
    %39 = vector.broadcast %37 : vector<32x1xf32> to vector<32x324xf32>
    %40 = arith.mulf %39, %38 : vector<32x324xf32>
    %41 = arith.addf %36, %40 : vector<32x324xf32>
    %42 = vector.extract_strided_slice %2 {offsets = [0, 5], sizes = [32, 1], strides = [1, 1]} : vector<32x9xf32> to vector<32x1xf32>
    %43 = vector.extract_strided_slice %15 {offsets = [0, 20], sizes = [32, 324], strides = [1, 1]} : vector<32x384xf32> to vector<32x324xf32>
    %44 = vector.broadcast %42 : vector<32x1xf32> to vector<32x324xf32>
    %45 = arith.mulf %44, %43 : vector<32x324xf32>
    %46 = arith.addf %41, %45 : vector<32x324xf32>
    %47 = vector.extract_strided_slice %2 {offsets = [0, 6], sizes = [32, 1], strides = [1, 1]} : vector<32x9xf32> to vector<32x1xf32>
    %48 = vector.extract_strided_slice %15 {offsets = [0, 36], sizes = [32, 324], strides = [1, 1]} : vector<32x384xf32> to vector<32x324xf32>
    %49 = vector.broadcast %47 : vector<32x1xf32> to vector<32x324xf32>
    %50 = arith.mulf %49, %48 : vector<32x324xf32>
    %51 = arith.addf %46, %50 : vector<32x324xf32>
    %52 = vector.extract_strided_slice %2 {offsets = [0, 7], sizes = [32, 1], strides = [1, 1]} : vector<32x9xf32> to vector<32x1xf32>
    %53 = vector.extract_strided_slice %15 {offsets = [0, 37], sizes = [32, 324], strides = [1, 1]} : vector<32x384xf32> to vector<32x324xf32>
    %54 = vector.broadcast %52 : vector<32x1xf32> to vector<32x324xf32>
    %55 = arith.mulf %54, %53 : vector<32x324xf32>
    %56 = arith.addf %51, %55 : vector<32x324xf32>
    %57 = vector.extract_strided_slice %2 {offsets = [0, 8], sizes = [32, 1], strides = [1, 1]} : vector<32x9xf32> to vector<32x1xf32>
    %58 = vector.extract_strided_slice %15 {offsets = [0, 38], sizes = [32, 324], strides = [1, 1]} : vector<32x384xf32> to vector<32x324xf32>
    %59 = vector.broadcast %57 : vector<32x1xf32> to vector<32x324xf32>
    %60 = arith.mulf %59, %58 : vector<32x324xf32>
    %61 = arith.addf %56, %60 : vector<32x324xf32>
    %62 = vector.broadcast %5 : vector<32x1xf32> to vector<32x324xf32>
    %63 = arith.addf %61, %62 : vector<32x324xf32>
    %cst_18 = arith.constant 0.000000e+00 : f32
    %64 = vector.broadcast %cst_18 : f32 to vector<32x324xf32>
    %65 = arith.maximumf %63, %64 : vector<32x324xf32>
    %66 = arith.truncf %65 : vector<32x324xf32> to vector<32x324xbf16>
    %cst_19 = arith.constant dense<0.000000e+00> : vector<16x324xf32>
    %67 = tpu.matmul %3, %66, %cst_19 {dimension_numbers = #tpu.dot_dimension_numbers<[1], [0], [0], [1], [0, 0, 1, 1], [], []>} : vector<16x32xbf16>, vector<32x324xbf16>, vector<16x324xf32> -> vector<16x324xf32>
    %68 = vector.broadcast %6 : vector<16x1xf32> to vector<16x324xf32>
    %69 = arith.addf %67, %68 : vector<16x324xf32>
    %c0_20 = arith.constant 0 : index
    %c0_21 = arith.constant 0 : index
    %c0_22 = arith.constant 0 : index
    %70 = vector.load %arg9[%c0_20, %c0_21, %c0_22] : memref<2x16x324xf32, #tpu.memory_space<vmem>>, vector<1x16x324xf32>
    %71 = vector.shape_cast %70 : vector<1x16x324xf32> to vector<16x324xf32>
    %72 = vector.shape_cast %69 : vector<16x324xf32> to vector<1x16x324xf32>
    tpu.vector_store %arg9[%c0_20, %c0_21, %c0_22], %72 {strides = array<i32>} : memref<2x16x324xf32, #tpu.memory_space<vmem>>, vector<1x16x324xf32>,
    %c1 = arith.constant 1 : index
    %c0_23 = arith.constant 0 : index
    %c0_24 = arith.constant 0 : index
    %73 = vector.load %arg1[%c1, %c0_23, %c0_24] : memref<2x32x384xbf16, #tpu.memory_space<vmem>>, vector<1x32x384xbf16>
    %74 = vector.shape_cast %73 : vector<1x32x384xbf16> to vector<32x384xbf16>
    %cst_25 = arith.constant dense<0.000000e+00> : vector<32x384xf32>
    %75 = tpu.matmul %1, %74, %cst_25 {dimension_numbers = #tpu.dot_dimension_numbers<[1], [0], [0], [1], [0, 0, 1, 1], [], []>} : vector<32x32xbf16>, vector<32x384xbf16>, vector<32x384xf32> -> vector<32x384xf32>
    %76 = vector.broadcast %4 : vector<32x1xf32> to vector<32x384xf32>
    %77 = arith.addf %75, %76 : vector<32x384xf32>
    %cst_26 = arith.constant 0.000000e+00 : f32
    %78 = vector.broadcast %cst_26 : f32 to vector<32x384xf32>
    %79 = arith.maximumf %77, %78 : vector<32x384xf32>
    %80 = vector.broadcast %0 : vector<1x384xf32> to vector<32x384xf32>
    %81 = arith.mulf %80, %79 : vector<32x384xf32>
    %cst_27 = arith.constant 0.000000e+00 : f32
    %82 = vector.broadcast %cst_27 : f32 to vector<32x324xf32>
    %83 = vector.extract_strided_slice %2 {offsets = [0, 0], sizes = [32, 1], strides = [1, 1]} : vector<32x9xf32> to vector<32x1xf32>
    %84 = vector.extract_strided_slice %81 {offsets = [0, 0], sizes = [32, 324], strides = [1, 1]} : vector<32x384xf32> to vector<32x324xf32>
    %85 = vector.broadcast %83 : vector<32x1xf32> to vector<32x324xf32>
    %86 = arith.mulf %85, %84 : vector<32x324xf32>
    %87 = arith.addf %82, %86 : vector<32x324xf32>
    %88 = vector.extract_strided_slice %2 {offsets = [0, 1], sizes = [32, 1], strides = [1, 1]} : vector<32x9xf32> to vector<32x1xf32>
    %89 = vector.extract_strided_slice %81 {offsets = [0, 1], sizes = [32, 324], strides = [1, 1]} : vector<32x384xf32> to vector<32x324xf32>
    %90 = vector.broadcast %88 : vector<32x1xf32> to vector<32x324xf32>
    %91 = arith.mulf %90, %89 : vector<32x324xf32>
    %92 = arith.addf %87, %91 : vector<32x324xf32>
    %93 = vector.extract_strided_slice %2 {offsets = [0, 2], sizes = [32, 1], strides = [1, 1]} : vector<32x9xf32> to vector<32x1xf32>
    %94 = vector.extract_strided_slice %81 {offsets = [0, 2], sizes = [32, 324], strides = [1, 1]} : vector<32x384xf32> to vector<32x324xf32>
    %95 = vector.broadcast %93 : vector<32x1xf32> to vector<32x324xf32>
    %96 = arith.mulf %95, %94 : vector<32x324xf32>
    %97 = arith.addf %92, %96 : vector<32x324xf32>
    %98 = vector.extract_strided_slice %2 {offsets = [0, 3], sizes = [32, 1], strides = [1, 1]} : vector<32x9xf32> to vector<32x1xf32>
    %99 = vector.extract_strided_slice %81 {offsets = [0, 18], sizes = [32, 324], strides = [1, 1]} : vector<32x384xf32> to vector<32x324xf32>
    %100 = vector.broadcast %98 : vector<32x1xf32> to vector<32x324xf32>
    %101 = arith.mulf %100, %99 : vector<32x324xf32>
    %102 = arith.addf %97, %101 : vector<32x324xf32>
    %103 = vector.extract_strided_slice %2 {offsets = [0, 4], sizes = [32, 1], strides = [1, 1]} : vector<32x9xf32> to vector<32x1xf32>
    %104 = vector.extract_strided_slice %81 {offsets = [0, 19], sizes = [32, 324], strides = [1, 1]} : vector<32x384xf32> to vector<32x324xf32>
    %105 = vector.broadcast %103 : vector<32x1xf32> to vector<32x324xf32>
    %106 = arith.mulf %105, %104 : vector<32x324xf32>
    %107 = arith.addf %102, %106 : vector<32x324xf32>
    %108 = vector.extract_strided_slice %2 {offsets = [0, 5], sizes = [32, 1], strides = [1, 1]} : vector<32x9xf32> to vector<32x1xf32>
    %109 = vector.extract_strided_slice %81 {offsets = [0, 20], sizes = [32, 324], strides = [1, 1]} : vector<32x384xf32> to vector<32x324xf32>
    %110 = vector.broadcast %108 : vector<32x1xf32> to vector<32x324xf32>
    %111 = arith.mulf %110, %109 : vector<32x324xf32>
    %112 = arith.addf %107, %111 : vector<32x324xf32>
    %113 = vector.extract_strided_slice %2 {offsets = [0, 6], sizes = [32, 1], strides = [1, 1]} : vector<32x9xf32> to vector<32x1xf32>
    %114 = vector.extract_strided_slice %81 {offsets = [0, 36], sizes = [32, 324], strides = [1, 1]} : vector<32x384xf32> to vector<32x324xf32>
    %115 = vector.broadcast %113 : vector<32x1xf32> to vector<32x324xf32>
    %116 = arith.mulf %115, %114 : vector<32x324xf32>
    %117 = arith.addf %112, %116 : vector<32x324xf32>
    %118 = vector.extract_strided_slice %2 {offsets = [0, 7], sizes = [32, 1], strides = [1, 1]} : vector<32x9xf32> to vector<32x1xf32>
    %119 = vector.extract_strided_slice %81 {offsets = [0, 37], sizes = [32, 324], strides = [1, 1]} : vector<32x384xf32> to vector<32x324xf32>
    %120 = vector.broadcast %118 : vector<32x1xf32> to vector<32x324xf32>
    %121 = arith.mulf %120, %119 : vector<32x324xf32>
    %122 = arith.addf %117, %121 : vector<32x324xf32>
    %123 = vector.extract_strided_slice %2 {offsets = [0, 8], sizes = [32, 1], strides = [1, 1]} : vector<32x9xf32> to vector<32x1xf32>
    %124 = vector.extract_strided_slice %81 {offsets = [0, 38], sizes = [32, 324], strides = [1, 1]} : vector<32x384xf32> to vector<32x324xf32>
    %125 = vector.broadcast %123 : vector<32x1xf32> to vector<32x324xf32>
    %126 = arith.mulf %125, %124 : vector<32x324xf32>
    %127 = arith.addf %122, %126 : vector<32x324xf32>
    %128 = vector.broadcast %5 : vector<32x1xf32> to vector<32x324xf32>
    %129 = arith.addf %127, %128 : vector<32x324xf32>
    %cst_28 = arith.constant 0.000000e+00 : f32
    %130 = vector.broadcast %cst_28 : f32 to vector<32x324xf32>
    %131 = arith.maximumf %129, %130 : vector<32x324xf32>
    %132 = arith.truncf %131 : vector<32x324xf32> to vector<32x324xbf16>
    %cst_29 = arith.constant dense<0.000000e+00> : vector<16x324xf32>
    %133 = tpu.matmul %3, %132, %cst_29 {dimension_numbers = #tpu.dot_dimension_numbers<[1], [0], [0], [1], [0, 0, 1, 1], [], []>} : vector<16x32xbf16>, vector<32x324xbf16>, vector<16x324xf32> -> vector<16x324xf32>
    %134 = vector.broadcast %6 : vector<16x1xf32> to vector<16x324xf32>
    %135 = arith.addf %133, %134 : vector<16x324xf32>
    %c1_30 = arith.constant 1 : index
    %c0_31 = arith.constant 0 : index
    %c0_32 = arith.constant 0 : index
    %136 = vector.load %arg9[%c1_30, %c0_31, %c0_32] : memref<2x16x324xf32, #tpu.memory_space<vmem>>, vector<1x16x324xf32>
    %137 = vector.shape_cast %136 : vector<1x16x324xf32> to vector<16x324xf32>
    %138 = vector.shape_cast %135 : vector<16x324xf32> to vector<1x16x324xf32>
    tpu.vector_store %arg9[%c1_30, %c0_31, %c0_32], %138 {strides = array<i32>} : memref<2x16x324xf32, #tpu.memory_space<vmem>>, vector<1x16x324xf32>,
    return
  }
  func.func @transform_0(%arg0: i32) -> (i32, i32, i32) {
    %c0_i32 = arith.constant 0 : i32
    %c0_i32_0 = arith.constant 0 : i32
    %c0_i32_1 = arith.constant 0 : i32
    return %arg0, %c0_i32, %c0_i32_0 : i32, i32, i32
  }
  func.func @transform_1(%arg0: i32) -> (i32, i32) {
    %c0_i32 = arith.constant 0 : i32
    %c0_i32_0 = arith.constant 0 : i32
    %c0_i32_1 = arith.constant 0 : i32
    return %c0_i32, %c0_i32_0 : i32, i32
  }
  func.func @transform_2(%arg0: i32) -> (i32, i32) {
    %c0_i32 = arith.constant 0 : i32
    %c0_i32_0 = arith.constant 0 : i32
    %c0_i32_1 = arith.constant 0 : i32
    return %c0_i32, %c0_i32_0 : i32, i32
  }
  func.func @transform_3(%arg0: i32) -> (i32, i32) {
    %c0_i32 = arith.constant 0 : i32
    %c0_i32_0 = arith.constant 0 : i32
    %c0_i32_1 = arith.constant 0 : i32
    return %c0_i32, %c0_i32_0 : i32, i32
  }
  func.func @transform_4(%arg0: i32) -> (i32, i32) {
    %c0_i32 = arith.constant 0 : i32
    %c0_i32_0 = arith.constant 0 : i32
    %c0_i32_1 = arith.constant 0 : i32
    return %c0_i32, %c0_i32_0 : i32, i32
  }
  func.func @transform_5(%arg0: i32) -> (i32, i32) {
    %c0_i32 = arith.constant 0 : i32
    %c0_i32_0 = arith.constant 0 : i32
    %c0_i32_1 = arith.constant 0 : i32
    return %c0_i32, %c0_i32_0 : i32, i32
  }
  func.func @transform_6(%arg0: i32) -> (i32, i32) {
    %c0_i32 = arith.constant 0 : i32
    %c0_i32_0 = arith.constant 0 : i32
    %c0_i32_1 = arith.constant 0 : i32
    return %c0_i32, %c0_i32_0 : i32, i32
  }
  func.func @transform_7(%arg0: i32) -> (i32, i32) {
    %c0_i32 = arith.constant 0 : i32
    %c0_i32_0 = arith.constant 0 : i32
    %c0_i32_1 = arith.constant 0 : i32
    return %c0_i32, %c0_i32_0 : i32, i32
  }
  func.func @transform_8(%arg0: i32) -> (i32, i32, i32) {
    %c0_i32 = arith.constant 0 : i32
    %c0_i32_0 = arith.constant 0 : i32
    %c0_i32_1 = arith.constant 0 : i32
    return %arg0, %c0_i32, %c0_i32_0 : i32, i32, i32
  }
}

</mosaic_0001>

<bundles_post_ra>
// kernel: spnas_init_block_forward.1
= control target key start
LH: loop header
LB: loop body
LE: loop exit
PB: predicated region body
PF: predicated region fallthrough
CT: control target
= control target key end

     0   :  { %v4057_v0 = vmov 0   ;;  %v2359_v3 = vmov 1   ;;  %vm121_vm0 = vcmask 261120   ;;  %v2360_v14 = vmov 2   ;;  %s2368_s15 = smov 126   ;;  %s2369_s16 = smov 110   ;;  %s4048_s3 = inlined_call_operand.vmem [shape: f32[32,1], index: 3, kind: input, shape index: {}]   ;;  %s4049_s0 = inlined_call_operand.vmem [shape: bf16[2,32,384], index: 0, kind: input, shape index: {}]   ;;  %s4050_s2 = inlined_call_operand.vmem [shape: bf16[32,32], index: 2, kind: input, shape index: {}]   ;;  %s4051_s4 = inlined_call_operand.vmem [shape: f32[32,9], index: 4, kind: input, shape index: {}]   ;;  %s4052_s1 = inlined_call_operand.vmem [shape: f32[1,384], index: 1, kind: input, shape index: {}]   ;;  %s4053_s5 = inlined_call_operand.vmem [shape: f32[32,1], index: 5, kind: input, shape index: {}]   ;;  %s4054_s6 = inlined_call_operand.vmem [shape: bf16[16,32], index: 6, kind: input, shape index: {}]   ;;  %s4055_s7 = inlined_call_operand.vmem [shape: f32[16,1], index: 7, kind: input, shape index: {}]   ;;  %s4056_s8 = inlined_call_operand.vmem [shape: f32[2,16,324], index: 8, kind: output, shape index: {}]  }
   0x1   :  { %2311 = vset.pattern.permute.xlu1 %v4057_v0  ;;  %v41_v1 = vld [vmem:[%s4048_s3] sm:$0xff]  ;;  %160 = vmatprep.mubr.bf16.mxu0 %v4057_v0  ;;  %v2336_v2 = vld [vmem:[%s4049_s0 + $0x1c] ss:$12 sps:$4 sm:$0xff]   ;;  %v2463_v13 = vld [vmem:[%s4051_s4 + $0x10] sm:$0xff]  ;;  %v2361_v17 = vmov 3   ;;  %v2362_v18 = vmov 5   ;;  %v243_v43 = vlaneseq }
   0x2   :  { %61 = vperm.xlu1 %2311, %v41_v1   ;;  %2312 = vset.pattern.permute.xlu0 %v2359_v3  ;;  %v2338_v4 = vld [vmem:[%s4049_s0 + $0x20] ss:$12 sps:$4 sm:$0xff]   ;;  %v2339_v5 = vld [vmem:[%s4049_s0 + $0x18] ss:$12 sps:$4 sm:$0xff]   ;;  %v2342_v8 = vld [vmem:[%s4049_s0 + $0x8] ss:$12 sps:$4 sm:$0xff]  }
   0x3   :  { %v42_v6 = vld [vmem:[%s4048_s3 + $0x8] sm:$0xff]  ;;  %140 = vmatprep.subr.bf16.mxu0 %v2336_v2  ;;  %v2340_v7 = vld [vmem:[%s4049_s0 + $0x4] ss:$12 sps:$4 sm:$0xff]   ;;  %2260 = vmatprep.subr.bf16.mxu1 %v2338_v4  ;;  %v2454_v11 = vld [vmem:[%s4051_s4 + $0x18] sm:$0xff]  ;;  %v2363_v19 = vmov 4   ;;  %v2364_v20 = vmov 6  }
   0x4   :  { %141 = vmatpush1.bf16.msra.mxu0 %v2339_v5  ;;  %2261 = vmatpush3.bf16.msra.mxu1 %v2338_v4  ;;  %v2343_v9 = vld [vmem:[%s4049_s0] ss:$12 sps:$4 sm:$0xff]   ;;  %v2365_v21 = vmov 8   ;;  %v43_v22 = vld [vmem:[%s4048_s3 + $0x10] sm:$0xff]  ;;  %v44_v23 = vld [vmem:[%s4048_s3 + $0x18] sm:$0xff]  ;;  %v2366_v24 = vmov 7  }
   0x5   :  { %142 = vmatprep.subr.bf16.mxu0 %v2340_v7  ;;  %2262 = vmatprep.subr.bf16.mxu1 %v2342_v8  ;;  %v2344_v10 = vld [vmem:[%s4050_s2] sm:$0xff]   ;;  %v2345_v12 = vld [vmem:[%s4050_s2 + $0x8] sm:$0xff]   ;;  %v244_v44 = vshrl.u32 %v243_v43, 7  ;;  %s2370_s17 = smov 109   ;;  %s2371_s18 = smov 108   ;;  %vm2376_vm1 = vmmov 0  }
   0x6   :  { %66 = vperm.xlu1 %2311, %v42_v6   ;;  %2264 = vmatprep.mubr.msk.bf16.mxu1 %vm121_vm0, %v2344_v10  ;;  %v2476_v15 = vld [vmem:[%s4051_s4] sm:$0xff]  ;;  %v36_v16 = vld [vmem:[%s4051_s4 + $0x8] sm:$0xff]  ;;  %s2372_s19 = smov 92   ;;  %s2373_s20 = smov 91   ;;  %vm378_vm2 = vcmask 1039360   ;;  %vm475_vm3 = vcmask 1031168  }
   0x7   :  { %323 = vperm.xlu0 %2312, %v2463_v13   ;;  %v245_v47 = vsub.s32 0, %v244_v44  ;;  %v30_v48 = vld [vmem:[%s4052_s1] sm:$0x7]  ;;  %v253_v49 = vsub.s32 2, %v244_v44  ;;  %s2367_s1 = smov 127   ;;  %v249_v4 = vsub.s32 1, %v244_v44 }
   0x8   :  { %143 = vmatpush1.bf16.msra.mxu0 %v2343_v9  ;;  %2263 = vmatpush3.bf16.msra.mxu1 %v2342_v8  ;;  %s2374_s25 = smov 90   ;;  %vm572_vm4 = vcmask 900096   ;;  %vm669_vm5 = vcmask 891904   ;;  %vm766_vm6 = vcmask 883712   ;;  %vm863_vm7 = vcmask 752640  }
   0x9   :  { %v2561_v54 = vrot.slane %v30_v48, %v245_v47  ;;  %v2564_v57 = vrot.slane %v30_v48, %v253_v49  ;;  %v2589_v9 = vrot.slane %v30_v48, %v249_v4  ;;  %vm960_vm8 = vcmask 744448  }
   0xa   :  { %2313 = vset.pattern.permute.xlu1 %v2359_v3  ;;  %vm1057_vm9 = vcmask 736256   ;;  %vm1244_vm10 = vcmask 556032  }
   0xb   :  { %327 = vperm.xlu1 %2313, %v2454_v11   ;;  %2213 = vmatmul.mubr.msk.bf16.vlgmr.msra.gmra.mxu0 %vm121_vm0, %v2344_v10  ;;  %4186 = vst [vmem:[#allocation24_spill] sm:$0xff] %v2561_v54  ;;  %4187 = vst [vmem:[#allocation25_spill] sm:$0xff] %v2564_v57 }
   0xc   :  { %2265 = vmatmul.mubr.msk.bf16.vlgmr.msra.gmra.mxu1 %vm121_vm0, %v2345_v12  ;;  %170 = vmatprep.mubr.bf16.mxu0 %v4057_v0  ;;  %4190 = vst [vmem:[#allocation28_spill] sm:$0xff] %v2589_v9 }
   0xd   :  { %1190 = vmatprep.mubr.bf16.mxu1 %v4057_v0  ;;  %2315 = vset.pattern.permute.xlu0 %v2360_v14 }
   0xe   :  { %424 = vperm.xlu0 %2315, %v2454_v11  }
   0xf   :  { %2314 = vset.pattern.permute.xlu1 %v2360_v14 }
  0x10   :  { %420 = vperm.xlu1 %2314, %v2463_v13  }
  0x12   :  { %416 = vperm.xlu0 %2315, %v36_v16  }
  0x13   :  { %2214 = vmatmul.mubr.msk.bf16.gmra.mxu0 %vm121_vm0, %v2345_v12 }
  0x14   :  { %2316 = vset.pattern.permute.xlu1 %v2359_v3 }
  0x15   :  { %315 = vperm.xlu1 %2316, %v2476_v15  }
  0x16   :  { %2319 = vset.pattern.permute.xlu0 %v2361_v17 }
  0x17   :  { %517 = vperm.xlu0 %2319, %v2463_v13  }
  0x19   :  { %319 = vperm.xlu1 %2316, %v36_v16  }
  0x1b   :  { %509 = vperm.xlu0 %2319, %v2476_v15  }
  0x1d   :  { %2317 = vset.pattern.permute.xlu1 %v2361_v17 }
  0x1e   :  { %521 = vperm.xlu1 %2317, %v2454_v11  }
  0x1f   :  { %2323 = vset.pattern.permute.xlu0 %v2362_v18 }
  0x20   :  { %715 = vperm.xlu0 %2323, %v2454_v11  }
  0x22   :  { %2318 = vset.pattern.permute.xlu1 %v2360_v14 }
  0x23   :  { %412 = vperm.xlu1 %2318, %v2476_v15  }
  0x24   :  { %707 = vperm.xlu0 %2323, %v36_v16  }
  0x27   :  { %2320 = vset.pattern.permute.xlu1 %v2363_v19 }
  0x28   :  { %614 = vperm.xlu1 %2320, %v2463_v13   ;;  %2327 = vset.pattern.permute.xlu0 %v2364_v20 }
  0x29   :  { %808 = vperm.xlu0 %2327, %v2463_v13  }
  0x2c   :  { %618 = vperm.xlu1 %2320, %v2454_v11  }
  0x2d   :  { %800 = vperm.xlu0 %2327, %v2476_v15  }
  0x30   :  { %2321 = vset.pattern.permute.xlu1 %v2361_v17 }
  0x31   :  { %513 = vperm.xlu1 %2321, %v36_v16   ;;  %2331 = vset.pattern.permute.xlu0 %v2365_v21 }
  0x32   :  { %1006 = vperm.xlu0 %2331, %v2454_v11  }
  0x35   :  { %2322 = vset.pattern.permute.xlu1 %v2362_v18 }
  0x36   :  { %711 = vperm.xlu1 %2322, %v2463_v13   ;;  %994 = vperm.xlu0 %2331, %v2476_v15  }
  0x3a   :  { %2324 = vset.pattern.permute.xlu1 %v2363_v19  ;;  %2333 = vset.pattern.permute.xlu0 %v4057_v0 }
  0x3b   :  { %606 = vperm.xlu1 %2324, %v2476_v15   ;;  %71 = vperm.xlu0 %2333, %v43_v22  }
  0x3f   :  { %610 = vperm.xlu1 %2324, %v36_v16   ;;  %76 = vperm.xlu0 %2333, %v44_v23  }
  0x43   :  { %2325 = vset.pattern.permute.xlu1 %v2364_v20  ;;  %282 = vperm.xlu0 %2333, %v2463_v13  }
  0x44   :  { %812 = vperm.xlu1 %2325, %v2454_v11  }
  0x47   :  { %277 = vperm.xlu0 %2333, %v36_v16  }
  0x48   :  { %2326 = vset.pattern.permute.xlu1 %v2362_v18 }
  0x49   :  { %703 = vperm.xlu1 %2326, %v2476_v15  }
  0x4d   :  { %2328 = vset.pattern.permute.xlu1 %v2366_v24 }
  0x4e   :  { %905 = vperm.xlu1 %2328, %v2463_v13  }
  0x52   :  { %909 = vperm.xlu1 %2328, %v2454_v11  }
  0x56   :  { %2329 = vset.pattern.permute.xlu1 %v2364_v20 }
  0x57   :  { %804 = vperm.xlu1 %2329, %v36_v16  }
  0x5b   :  { %2330 = vset.pattern.permute.xlu1 %v2365_v21 }
  0x5c   :  { %1002 = vperm.xlu1 %2330, %v2463_v13  }
  0x60   :  { %2332 = vset.pattern.permute.xlu1 %v2366_v24 }
  0x61   :  { %897 = vperm.xlu1 %2332, %v2476_v15  }
  0x65   :  { %901 = vperm.xlu1 %2332, %v36_v16  }
  0x69   :  { %2334 = vset.pattern.permute.xlu1 %v2365_v21 }
  0x6a   :  { %998 = vperm.xlu1 %2334, %v36_v16  }
  0x6e   :  { %2335 = vset.pattern.permute.xlu1 %v4057_v0 }
  0x6f   :  { %287 = vperm.xlu1 %2335, %v2454_v11  }
  0x73   :  { %272 = vperm.xlu1 %2335, %v2476_v15  }
  0x7d   :  { %v2517_v27 = vpop.permute.xlu1 %61 }
  0x7e   :  { %4166 = vst [vmem:[#allocation4_spill] sm:$0xff] %v2517_v27 }
  0x81   :  { %v2521_v29 = vpop.permute.xlu1 %66 }
  0x82   :  { %v2513_v25 = vpop.permute.xlu0 %323  ;;  %4168 = vst [vmem:[#allocation6_spill] sm:$0xff] %v2521_v29 }
  0x83   :  { %4164 = vst [vmem:[#allocation2_spill] sm:$0xff] %v2513_v25 }
  0x86   :  { %v2525_v31 = vpop.permute.xlu1 %327 }
  0x87   :  { %4170 = vst [vmem:[#allocation8_spill] sm:$0xff] %v2525_v31 }
  0x89   :  { %v2515_v26 = vpop.permute.xlu0 %424 }
  0x8a   :  { %4165 = vst [vmem:[#allocation3_spill] sm:$0xff] %v2515_v26 }
  0x8b   :  { %v2529_v33 = vpop.permute.xlu1 %420 }
  0x8c   :  { %4172 = vst [vmem:[#allocation10_spill] sm:$0xff] %v2529_v33 }
  0x8d   :  { %v2519_v28 = vpop.permute.xlu0 %416 }
  0x8e   :  { %4167 = vst [vmem:[#allocation5_spill] sm:$0xff] %v2519_v28 }
  0x90   :  { %v2533_v35 = vpop.permute.xlu1 %315 }
  0x91   :  { %4174 = vst [vmem:[#allocation12_spill] sm:$0xff] %v2533_v35 }
  0x92   :  { %v2523_v30 = vpop.permute.xlu0 %517 }
  0x93   :  { %4169 = vst [vmem:[#allocation7_spill] sm:$0xff] %v2523_v30 }
  0x94   :  { %v2537_v37 = vpop.permute.xlu1 %319 }
  0x95   :  { %4176 = vst [vmem:[#allocation14_spill] sm:$0xff] %v2537_v37 }
  0x96   :  { %v2527_v32 = vpop.permute.xlu0 %509 }
  0x97   :  { %4171 = vst [vmem:[#allocation9_spill] sm:$0xff] %v2527_v32 }
  0x99   :  { %v2541_v39 = vpop.permute.xlu1 %521 }
  0x9a   :  { %4178 = vst [vmem:[#allocation16_spill] sm:$0xff] %v2541_v39 }
  0x9b   :  { %v2531_v34 = vpop.permute.xlu0 %715 }
  0x9c   :  { %4173 = vst [vmem:[#allocation11_spill] sm:$0xff] %v2531_v34 }
  0x9e   :  { %v2545_v41 = vpop.permute.xlu1 %412 }
  0x9f   :  { %v2535_v36 = vpop.permute.xlu0 %707  ;;  %4180 = vst [vmem:[#allocation18_spill] sm:$0xff] %v2545_v41 }
  0xa0   :  { %4175 = vst [vmem:[#allocation13_spill] sm:$0xff] %v2535_v36 }
  0xa3   :  { %v2549_v45 = vpop.permute.xlu1 %614 }
  0xa4   :  { %v2539_v38 = vpop.permute.xlu0 %808  ;;  %4182 = vst [vmem:[#allocation20_spill] sm:$0xff] %v2549_v45 }
  0xa5   :  { %4177 = vst [vmem:[#allocation15_spill] sm:$0xff] %v2539_v38 }
  0xa7   :  { %v2556_v50 = vpop.permute.xlu1 %618 }
  0xa8   :  { %v2543_v40 = vpop.permute.xlu0 %800  ;;  %4184 = vst [vmem:[#allocation22_spill] sm:$0xff] %v2556_v50 }
  0xa9   :  { %4179 = vst [vmem:[#allocation17_spill] sm:$0xff] %v2543_v40 }
  0xac   :  { %v2569_v61 = vpop.permute.xlu1 %513 }
  0xad   :  { %v2547_v42 = vpop.permute.xlu0 %1006  ;;  %4188 = vst [vmem:[#allocation26_spill] sm:$0xff] %v2569_v61 }
  0xae   :  { %4181 = vst [vmem:[#allocation19_spill] sm:$0xff] %v2547_v42 }
  0xb1   :  { %v2551_v46 = vpop.permute.xlu0 %994  ;;  %v2583_v6 = vpop.permute.xlu1 %711 }
  0xb2   :  { %4183 = vst [vmem:[#allocation21_spill] sm:$0xff] %v2551_v46  ;;  %4189 = vst [vmem:[#allocation27_spill] sm:$0xff] %v2583_v6 }
  0xb6   :  { %v2558_v52 = vpop.permute.xlu0 %71  ;;  %v2596_v13 = vpop.permute.xlu1 %606 }
  0xb7   :  { %4185 = vst [vmem:[#allocation23_spill] sm:$0xff] %v2558_v52  ;;  %4191 = vst [vmem:[#allocation29_spill] sm:$0xff] %v2596_v13 }
  0xba   :  { %v2614_v22 = vpop.permute.xlu1 %610 }
  0xbb   :  { %4193 = vst [vmem:[#allocation31_spill] sm:$0xff] %v2614_v22 }
  0xbf   :  { %v2629_v49 = vpop.permute.xlu1 %812 }
  0xc0   :  { %4195 = vst [vmem:[#allocation33_spill] sm:$0xff] %v2629_v49 }
  0xcb   :  { %v162_v51 = vpop.f32.mrf.mxu0 }
  0xcc   :  { %v163_v53 = vadd.f32 %v162_v51, %v2517_v27  ;;  %v2266_v55 = vpop.f32.mrf.mxu1 }
  0xcd   :  { %v224_v56 = vadd.f32 %v2266_v55, %v2558_v52  ;;  %v164_v1 = vpop.f32.mrf.mxu0 }
  0xce   :  { %v230_v58 = vmax.f32 %v163_v53, 0.0  ;;  %v165_v3 = vadd.f32 %v164_v1, %v2517_v27  ;;  %v215_v12 = vpop.f32.mrf.mxu1 }
  0xcf   :  { %v238_v59 = vmax.f32 %v224_v56, 0.0  ;;  %v216_v16 = vadd.f32 %v215_v12, %v2517_v27  ;;  %v166_v20 = vpop.f32.mrf.mxu0 }
  0xd0   :  { %v2567_v60 = vmul.f32 %v2561_v54, %v230_v58  ;;  %v231_v8 = vmax.f32 %v165_v3, 0.0  ;;  %v2267_v58 = vpop.f32.mrf.mxu1 }
  0xd1   :  { %v2572_v62 = vmul.f32 %v2564_v57, %v238_v59  ;;  %v232_v19 = vmax.f32 %v216_v16, 0.0  ;;  %v168_v43 = vpop.f32.mrf.mxu0  ;;  %v2640_v59 = vpop.permute.xlu1 %703 }
  0xd2   :  { %v330_v63 = vmul.f32 %v2533_v35, %v2567_v60  ;;  %v427_v5 = vmul.f32 %v2545_v41, %v2567_v60  ;;  %v524_v10 = vmul.f32 %v2527_v32, %v2567_v60  ;;  %v2600_v14 = vmul.f32 %v2589_v9, %v231_v8  ;;  %4196 = vst [vmem:[#allocation34_spill] sm:$0xff] %v2640_v59 }
  0xd3   :  { %v338_v2 = vmul.f32 %v2513_v25, %v2572_v62  ;;  %v435_v7 = vmul.f32 %v2529_v33, %v2572_v62  ;;  %v532_v11 = vmul.f32 %v2523_v30, %v2572_v62  ;;  %v621_v15 = vmul.f32 %v2596_v13, %v2567_v60  ;;  %v172_v12 = vpop.f32.mrf.mxu0 }
  0xd4   :  { %354 = vrot.lane.b32.xlu1 %v330_v63, %s2367_s1  ;;  %4192 = vst [vmem:[#allocation30_spill] sm:$0xff] %v2600_v14  ;;  %v629_v17 = vmul.f32 %v2549_v45, %v2572_v62  ;;  %v331_v18 = vmul.f32 %v2533_v35, %v2600_v14  ;;  %v726_v21 = vmul.f32 %v2583_v6, %v2572_v62  ;;  %v2643_v63 = vpop.permute.xlu0 %76 }
  0xd5   :  { %370 = vrot.lane.b32.xlu0 %v338_v2, %s2367_s1  ;;  %v428_v23 = vmul.f32 %v2545_v41, %v2600_v14  ;;  %v2620_v24 = vmul.f32 %v2564_v57, %v232_v19  ;;  %v823_v44 = vmul.f32 %v2539_v38, %v2572_v62  ;;  %v169_v47 = vadd.f32 %v168_v43, %v2521_v29 }
  0xd6   :  { %v525_v48 = vmul.f32 %v2527_v32, %v2600_v14  ;;  %v622_v55 = vmul.f32 %v2596_v13, %v2600_v14  ;;  %4197 = vst [vmem:[#allocation35_spill] sm:$0xff] %v2643_v63  ;;  %v719_v2 = vmul.f32 %v2640_v59, %v2600_v14  ;;  %v227_v3 = vadd.f32 %v2267_v58, %v2643_v63 }
  0xd7   :  { %4194 = vst [vmem:[#allocation32_spill] sm:$0xff] %v2620_v24  ;;  %v332_v51 = vmul.f32 %v2533_v35, %v2620_v24  ;;  %v234_v53 = vmax.f32 %v169_v47, 0.0  ;;  %v429_v56 = vmul.f32 %v2545_v41, %v2620_v24  ;;  %v526_v4 = vmul.f32 %v2527_v32, %v2620_v24 }
  0xd8   :  { %451 = vrot.lane.b32.xlu1 %v427_v5, %s2368_s15  ;;  %v623_v8 = vmul.f32 %v2596_v13, %v2620_v24  ;;  %v173_v16 = vadd.f32 %v172_v12, %v2558_v52  ;;  %v1011_v27 = vmul.f32 %v2551_v46, %v2620_v24 }
  0xd9   :  { %467 = vrot.lane.b32.xlu0 %v435_v7, %s2368_s15  ;;  %v2646_v1 = vmul.f32 %v2589_v9, %v234_v53  ;;  %v241_v7 = vmax.f32 %v227_v3, 0.0 }
  0xdb   :  { %4198 = vst [vmem:[#allocation36_spill] sm:$0xff] %v2646_v1  ;;  %v334_v5 = vmul.f32 %v2537_v37, %v2646_v1  ;;  %v722_v47 = vmul.f32 %v2535_v36, %v2646_v1 }
  0xdc   :  { %548 = vrot.lane.b32.xlu1 %v524_v10, %s2369_s16  ;;  %v431_v10 = vmul.f32 %v2519_v28, %v2646_v1 }
  0xdd   :  { %564 = vrot.lane.b32.xlu0 %v532_v11, %s2369_s16  ;;  %v2664_v11 = vmul.f32 %v2564_v57, %v241_v7 }
  0xdf   :  { %v341_v19 = vmul.f32 %v2525_v31, %v2664_v11  ;;  %v632_v58 = vmul.f32 %v2556_v50, %v2664_v11  ;;  %v1020_v13 = vmul.f32 %v2547_v42, %v2664_v11 }
  0xe0   :  { %645 = vrot.lane.b32.xlu1 %v621_v15, %s2370_s17  ;;  %v720_v15 = vmul.f32 %v2640_v59, %v2620_v24 }
  0xe1   :  { %661 = vrot.lane.b32.xlu0 %v629_v17, %s2370_s17  ;;  %v528_v17 = vmul.f32 %v2569_v61, %v2646_v1 }
  0xe4   :  { %356 = vrot.lane.b32.xlu1 %v331_v18, %s2367_s1  ;;  %v167_v18 = vadd.f32 %v166_v20, %v2521_v29 }
  0xe5   :  { %758 = vrot.lane.b32.xlu0 %v726_v21, %s2371_s18  ;;  %v236_v21 = vmax.f32 %v173_v16, 0.0 }
  0xe6   :  { %v233_v43 = vmax.f32 %v167_v18, 0.0 }
  0xe7   :  { %v2685_v20 = vmul.f32 %v2561_v54, %v236_v21 }
  0xe8   :  { %453 = vrot.lane.b32.xlu1 %v428_v23, %s2368_s15  ;;  %v625_v23 = vmul.f32 %v2614_v22, %v2646_v1 }
  0xe9   :  { %855 = vrot.lane.b32.xlu0 %v823_v44, %s2372_s19  ;;  %v438_v44 = vmul.f32 %v2515_v26, %v2664_v11  ;;  %v336_v53 = vmul.f32 %v2513_v25, %v2685_v20  ;;  %v530_v3 = vmul.f32 %v2523_v30, %v2685_v20 }
  0xec   :  { %550 = vrot.lane.b32.xlu1 %v525_v48, %s2369_s16  ;;  %v2690_v48 = vmul.f32 %v2561_v54, %v233_v43  ;;  %v821_v43 = vmul.f32 %v2539_v38, %v2685_v20 }
  0xed   :  { %358 = vrot.lane.b32.xlu0 %v332_v51, %s2367_s1  ;;  %v535_v51 = vmul.f32 %v2541_v39, %v2664_v11 }
  0xee   :  { %4199 = vst [vmem:[#allocation37_spill] sm:$0xff] %v2690_v48 }
  0xf0   :  { %647 = vrot.lane.b32.xlu1 %v622_v55, %s2370_s17  ;;  %v333_v55 = vmul.f32 %v2537_v37, %v2690_v48 }
  0xf1   :  { %455 = vrot.lane.b32.xlu0 %v429_v56, %s2368_s15  ;;  %v433_v56 = vmul.f32 %v2529_v33, %v2685_v20 }
  0xf4   :  { %744 = vrot.lane.b32.xlu1 %v719_v2, %s2371_s18  ;;  %v2708_v2 = vpop.permute.xlu1 %905 }
  0xf5   :  { %552 = vrot.lane.b32.xlu0 %v526_v4, %s2369_s16  ;;  %4200 = vst [vmem:[#allocation38_spill] sm:$0xff] %v2708_v2  ;;  %v174_v4 = vpop.f32.mrf.mxu0 }
  0xf6   :  { %v175_v7 = vadd.f32 %v174_v4, %v2558_v52 }
  0xf8   :  { %362 = vrot.lane.b32.xlu1 %v334_v5, %s2367_s1  ;;  %v430_v5 = vmul.f32 %v2519_v28, %v2690_v48  ;;  %v2721_v12 = vpop.permute.xlu1 %909  ;;  %v237_v16 = vmax.f32 %v175_v7, 0.0 }
  0xf9   :  { %649 = vrot.lane.b32.xlu0 %v623_v8, %s2370_s17  ;;  %v627_v8 = vmul.f32 %v2549_v45, %v2685_v20  ;;  %4201 = vst [vmem:[#allocation39_spill] sm:$0xff] %v2721_v12 }
  0xfc   :  { %459 = vrot.lane.b32.xlu1 %v431_v10, %s2368_s15  ;;  %v729_v10 = vmul.f32 %v2531_v34, %v2664_v11  ;;  %v2732_v21 = vpop.permute.xlu1 %804 }
  0xfd   :  { %746 = vrot.lane.b32.xlu0 %v720_v15, %s2371_s18  ;;  %v218_v15 = vpop.f32.mrf.mxu1  ;;  %4202 = vst [vmem:[#allocation40_spill] sm:$0xff] %v2732_v21  ;;  %v818_v32 = vmul.f32 %v2732_v21, %v2690_v48 }
  0xfe   :  { %v219_v18 = vadd.f32 %v218_v15, %v2521_v29 }
 0x100   :  { %556 = vrot.lane.b32.xlu1 %v528_v17, %s2369_s16  ;;  %v724_v17 = vmul.f32 %v2583_v6, %v2685_v20 }
 0x101   :  { %376 = vrot.lane.b32.xlu0 %v341_v19, %s2367_s1  ;;  %v527_v19 = vmul.f32 %v2569_v61, %v2690_v48 }
 0x104   :  { %653 = vrot.lane.b32.xlu1 %v625_v23, %s2370_s17  ;;  %v2735_v23 = vmul.f32 %v2589_v9, %v237_v16 }
 0x105   :  { %473 = vrot.lane.b32.xlu0 %v438_v44, %s2368_s15  ;;  %v235_v44 = vmax.f32 %v219_v18, 0.0 }
 0x106   :  { %v531_v7 = vmul.f32 %v2523_v30, %v2735_v23 }
 0x108   :  { %750 = vrot.lane.b32.xlu1 %v722_v47, %s2371_s18  ;;  %v826_v47 = vmul.f32 %v2629_v49, %v2664_v11 }
 0x109   :  { %570 = vrot.lane.b32.xlu0 %v535_v51, %s2369_s16  ;;  %v337_v51 = vmul.f32 %v2513_v25, %v2735_v23 }
 0x10c   :  { %366 = vrot.lane.b32.xlu1 %v336_v53, %s2367_s1  ;;  %v2746_v53 = vmul.f32 %v2564_v57, %v235_v44 }
 0x10d   :  { %360 = vrot.lane.b32.xlu0 %v333_v55, %s2367_s1  ;;  %v624_v55 = vmul.f32 %v2614_v22, %v2690_v48 }
 0x10e   :  { %4203 = vst [vmem:[#allocation41_spill] sm:$0xff] %v2746_v53  ;;  %v335_v4 = vmul.f32 %v2537_v37, %v2746_v53  ;;  %v432_v15 = vmul.f32 %v2519_v28, %v2746_v53  ;;  %v721_v37 = vmul.f32 %v2535_v36, %v2690_v48 }
 0x110   :  { %463 = vrot.lane.b32.xlu1 %v433_v56, %s2368_s15  ;;  %v2750_v56 = vpop.permute.xlu1 %1002 }
 0x111   :  { %667 = vrot.lane.b32.xlu0 %v632_v58, %s2370_s17  ;;  %4204 = vst [vmem:[#allocation42_spill] sm:$0xff] %v2750_v56  ;;  %v434_v58 = vmul.f32 %v2529_v33, %v2735_v23 }
 0x114   :  { %560 = vrot.lane.b32.xlu1 %v530_v3, %s2369_s16  ;;  %v176_v3 = vpop.f32.mrf.mxu0 }
 0x115   :  { %457 = vrot.lane.b32.xlu0 %v430_v5, %s2368_s15  ;;  %v2760_v5 = vpop.permute.xlu1 %897 }
 0x116   :  { %4205 = vst [vmem:[#allocation43_spill] sm:$0xff] %v2760_v5 }
 0x118   :  { %657 = vrot.lane.b32.xlu1 %v627_v8, %s2370_s17  ;;  %v177_v8 = vadd.f32 %v176_v3, %v2643_v63 }
 0x119   :  { %764 = vrot.lane.b32.xlu0 %v729_v10, %s2371_s18  ;;  %v178_v10 = vpop.f32.mrf.mxu0 }
 0x11a   :  { %v179_v16 = vadd.f32 %v178_v10, %v2643_v63  ;;  %v239_v18 = vmax.f32 %v177_v8, 0.0 }
 0x11c   :  { %754 = vrot.lane.b32.xlu1 %v724_v17, %s2371_s18  ;;  %v628_v17 = vmul.f32 %v2549_v45, %v2735_v23  ;;  %v240_v44 = vmax.f32 %v179_v16, 0.0  ;;  %v2805_v16 = vpop.permute.xlu0 %282  ;;  %v4109_v45 = vmov 0.0  }
 0x11d   :  { %554 = vrot.lane.b32.xlu0 %v527_v19, %s2369_s16  ;;  %v529_v19 = vmul.f32 %v2569_v61, %v2746_v53  ;;  %v923_v61 = vmul.f32 %v2721_v12, %v2664_v11  ;;  %2268 = vmatprep.subr.bf16.mxu0 %v4109_v45  ;;  %v914_v45 = vmul.f32 %v2760_v5, %v2620_v24 }
 0x120   :  { %851 = vrot.lane.b32.xlu1 %v821_v43, %s2372_s19  ;;  %v2774_v43 = vpop.permute.xlu1 %901 }
 0x121   :  { %861 = vrot.lane.b32.xlu0 %v826_v47, %s2372_s19  ;;  %4206 = vst [vmem:[#allocation44_spill] sm:$0xff] %v2774_v43  ;;  %v725_v47 = vmul.f32 %v2583_v6, %v2735_v23 }
 0x124   :  { %368 = vrot.lane.b32.xlu1 %v337_v51, %s2367_s1  ;;  %v2781_v51 = vmul.f32 %v2561_v54, %v239_v18  ;;  %v2790_v3 = vpop.permute.xlu1 %998  ;;  %v915_v54 = vmul.f32 %v2774_v43, %v2690_v48 }
 0x125   :  { %651 = vrot.lane.b32.xlu0 %v624_v55, %s2370_s17  ;;  %v626_v55 = vmul.f32 %v2614_v22, %v2746_v53  ;;  %4207 = vst [vmem:[#allocation45_spill] sm:$0xff] %v2790_v3  ;;  %v723_v22 = vmul.f32 %v2535_v36, %v2746_v53  ;;  %v817_v36 = vmul.f32 %v2543_v40, %v2620_v24 }
 0x126   :  { %v436_v10 = vmul.f32 %v2515_v26, %v2781_v51  ;;  %v533_v18 = vmul.f32 %v2541_v39, %v2781_v51  ;;  %v921_v29 = vmul.f32 %v2721_v12, %v2781_v51  ;;  %v1012_v52 = vmul.f32 %v2790_v3, %v2690_v48 }
 0x127   :  { %v297_v24 = vmul.f32 %v2805_v16, %v2735_v23 }
 0x128   :  { %465 = vrot.lane.b32.xlu1 %v434_v58, %s2368_s15  ;;  %v2788_v58 = vmul.f32 %v2589_v9, %v240_v44 }
 0x129   :  { %364 = vrot.lane.b32.xlu0 %v335_v4, %s2367_s1  ;;  %v822_v4 = vmul.f32 %v2539_v38, %v2735_v23 }
 0x12a   :  { %v340_v8 = vmul.f32 %v2525_v31, %v2788_v58  ;;  %v534_v44 = vmul.f32 %v2541_v39, %v2788_v58 }
 0x12c   :  { %562 = vrot.lane.b32.xlu1 %v531_v7, %s2369_s16  ;;  %v339_v7 = vmul.f32 %v2525_v31, %v2781_v51 }
 0x12d   :  { %461 = vrot.lane.b32.xlu0 %v432_v15, %s2368_s15  ;;  %v2802_v15 = vpop.permute.xlu1 %287 }
 0x130   :  { %659 = vrot.lane.b32.xlu1 %v628_v17, %s2370_s17  ;;  %v437_v17 = vmul.f32 %v2515_v26, %v2788_v58 }
 0x131   :  { %558 = vrot.lane.b32.xlu0 %v529_v19, %s2369_s16  ;;  %v2814_v19 = vpop.permute.xlu1 %272 }
 0x134   :  { %756 = vrot.lane.b32.xlu1 %v725_v47, %s2371_s18  ;;  %v2818_v47 = vpop.permute.xlu0 %277 }
 0x135   :  { %655 = vrot.lane.b32.xlu0 %v626_v55, %s2370_s17  ;;  %4208 = vst [vmem:[#allocation46_spill] sm:$0xff] %v2818_v47  ;;  %v630_v55 = vmul.f32 %v2556_v50, %v2781_v51 }
 0x138   :  { %853 = vrot.lane.b32.xlu1 %v822_v4, %s2372_s19 }
 0x139   :  { %372 = vrot.lane.b32.xlu0 %v339_v7, %s2367_s1  ;;  %v631_v7 = vmul.f32 %v2556_v50, %v2788_v58  ;;  %v920_v50 = vmul.f32 %v2708_v2, %v2572_v62 }
 0x13c   :  { %374 = vrot.lane.b32.xlu1 %v340_v8, %s2367_s1 }
 0x13d   :  { %469 = vrot.lane.b32.xlu0 %v436_v10, %s2368_s15  ;;  %v727_v10 = vmul.f32 %v2531_v34, %v2781_v51 }
 0x140   :  { %471 = vrot.lane.b32.xlu1 %v437_v17, %s2368_s15 }
 0x141   :  { %566 = vrot.lane.b32.xlu0 %v533_v18, %s2369_s16  ;;  %v728_v18 = vmul.f32 %v2531_v34, %v2788_v58 }
 0x144   :  { %568 = vrot.lane.b32.xlu1 %v534_v44, %s2369_s16 }
 0x145   :  { %663 = vrot.lane.b32.xlu0 %v630_v55, %s2370_s17  ;;  %v824_v55 = vmul.f32 %v2629_v49, %v2781_v51 }
 0x146   :  { %v2824_v4 = vpop.permute.xlu1 %354 }
 0x147   :  { %v2828_v8 = vpop.permute.xlu0 %370 }
 0x148   :  { %665 = vrot.lane.b32.xlu1 %v631_v7, %s2370_s17  ;;  %v825_v7 = vmul.f32 %v2629_v49, %v2788_v58 }
 0x149   :  { %760 = vrot.lane.b32.xlu0 %v727_v10, %s2371_s18 }
 0x14a   :  { %v2834_v17 = vpop.permute.xlu1 %451 }
 0x14b   :  { %4209 = vst [vmem:[#allocation47_spill] sm:$0xff] %v2834_v17  ;;  %v2838_v44 = vpop.permute.xlu0 %467 }
 0x14c   :  { %762 = vrot.lane.b32.xlu1 %v728_v18, %s2371_s18  ;;  %v919_v18 = vmul.f32 %v2708_v2, %v2735_v23 }
 0x14d   :  { %857 = vrot.lane.b32.xlu0 %v824_v55, %s2372_s19 }
 0x14e   :  { %v2844_v0 = vpop.permute.xlu1 %548 }
 0x14f   :  { %4210 = vst [vmem:[#allocation48_spill] sm:$0xff] %v2844_v0  ;;  %v2848_v10 = vpop.permute.xlu0 %564 }
 0x150   :  { %859 = vrot.lane.b32.xlu1 %v825_v7, %s2372_s19 }
 0x151   :  { %752 = vrot.lane.b32.xlu0 %v723_v22, %s2371_s18  ;;  %v922_v22 = vmul.f32 %v2721_v12, %v2788_v58  ;;  %v820_v12 = vmul.f32 %v2732_v21, %v2746_v53 }
 0x152   :  { %v2854_v34 = vpop.permute.xlu1 %645 }
 0x153   :  { %4211 = vst [vmem:[#allocation49_spill] sm:$0xff] %v2854_v34  ;;  %v2858_v55 = vpop.permute.xlu0 %661 }
 0x154   :  { %950 = vrot.lane.b32.xlu1 %v919_v18, %s2373_s20  ;;  %v47_v18 = vld [vmem:[%s4053_s5 + $0x10] sm:$0xff] }
 0x155   :  { %952 = vrot.lane.b32.xlu0 %v920_v50, %s2373_s20  ;;  %v48_v50 = vld [vmem:[%s4053_s5 + $0x18] sm:$0xff] }
 0x156   :  { %v2864_v49 = vpop.permute.xlu1 %356 }
 0x157   :  { %v2868_v7 = vpop.permute.xlu0 %758 }
 0x158   :  { %956 = vrot.lane.b32.xlu1 %v922_v22, %s2373_s20  ;;  %v718_v22 = vmul.f32 %v2640_v59, %v2567_v60  ;;  %v1017_v59 = vmul.f32 %v2750_v56, %v2572_v62 }
 0x159   :  { %958 = vrot.lane.b32.xlu0 %v923_v61, %s2373_s20 }
 0x15a   :  { %v2877_v39 = vpop.permute.xlu1 %453 }
 0x15b   :  { %4212 = vst [vmem:[#allocation50_spill] sm:$0xff] %v2877_v39  ;;  %v2882_v28 = vpop.permute.xlu0 %855  ;;  %v296_v39 = vmul.f32 %v2805_v16, %v2685_v20 }
 0x15c   :  { %1102 = vperm.xlu1 %2335, %v47_v18   ;;  %v918_v18 = vmul.f32 %v2708_v2, %v2685_v20 }
 0x15d   :  { %1107 = vperm.xlu0 %2333, %v48_v50  }
 0x15e   :  { %v2884_v26 = vpop.permute.xlu1 %550 }
 0x15f   :  { %4213 = vst [vmem:[#allocation51_spill] sm:$0xff] %v2884_v26  ;;  %v2888_v61 = vpop.permute.xlu0 %358 }
 0x160   :  { %4214 = vst [vmem:[#allocation52_spill] sm:$0xff] %v2888_v61  ;;  %742 = vrot.lane.b32.xlu1 %v718_v22, %s2371_s18  ;;  %v816_v22 = vmul.f32 %v2543_v40, %v2600_v14  ;;  %v301_v61 = vmul.f32 %v2802_v15, %v2664_v11 }
 0x161   :  { %748 = vrot.lane.b32.xlu0 %v721_v37, %s2371_s18 }
 0x162   :  { %v2894_v31 = vpop.permute.xlu1 %647 }
 0x163   :  { %4215 = vst [vmem:[#allocation53_spill] sm:$0xff] %v2894_v31  ;;  %v2898_v50 = vpop.permute.xlu0 %455 }
 0x164   :  { %4216 = vst [vmem:[#allocation54_spill] sm:$0xff] %v2898_v50  ;;  %948 = vrot.lane.b32.xlu1 %v918_v18, %s2373_s20  ;;  %v819_v18 = vmul.f32 %v2732_v21, %v2646_v1  ;;  %v298_v50 = vmul.f32 %v2805_v16, %v2572_v62 }
 0x165   :  { %954 = vrot.lane.b32.xlu0 %v921_v29, %s2373_s20 }
 0x166   :  { %v2904_v63 = vpop.permute.xlu1 %744 }
 0x167   :  { %4217 = vst [vmem:[#allocation55_spill] sm:$0xff] %v2904_v63  ;;  %v2908_v37 = vpop.permute.xlu0 %552 }
 0x168   :  { %4218 = vst [vmem:[#allocation56_spill] sm:$0xff] %v2908_v37  ;;  %841 = vrot.lane.b32.xlu1 %v816_v22, %s2372_s19  ;;  %v1016_v22 = vmul.f32 %v2750_v56, %v2735_v23 }
 0x169   :  { %843 = vrot.lane.b32.xlu0 %v817_v36, %s2372_s19 }
 0x16a   :  { %v2914_v9 = vpop.permute.xlu1 %362 }
 0x16b   :  { %4219 = vst [vmem:[#allocation57_spill] sm:$0xff] %v2914_v9  ;;  %v2918_v29 = vpop.permute.xlu0 %649 }
 0x16c   :  { %4220 = vst [vmem:[#allocation58_spill] sm:$0xff] %v2918_v29  ;;  %847 = vrot.lane.b32.xlu1 %v819_v18, %s2372_s19 }
 0x16d   :  { %849 = vrot.lane.b32.xlu0 %v820_v12, %s2372_s19  ;;  %v1019_v12 = vmul.f32 %v2547_v42, %v2788_v58 }
 0x16e   :  { %v2924_v2 = vpop.permute.xlu1 %459 }
 0x16f   :  { %4221 = vst [vmem:[#allocation59_spill] sm:$0xff] %v2924_v2  ;;  %v2928_v36 = vpop.permute.xlu0 %746 }
 0x170   :  { %4222 = vst [vmem:[#allocation60_spill] sm:$0xff] %v2928_v36  ;;  %1047 = vrot.lane.b32.xlu1 %v1016_v22, %s2374_s25  ;;  %v815_v22 = vmul.f32 %v2543_v40, %v2567_v60  ;;  %v1018_v40 = vmul.f32 %v2547_v42, %v2781_v51  ;;  %v917_v42 = vmul.f32 %v2774_v43, %v2746_v53 }
 0x171   :  { %1049 = vrot.lane.b32.xlu0 %v1017_v59, %s2374_s25 }
 0x172   :  { %v2934_v38 = vpop.permute.xlu1 %556 }
 0x173   :  { %4223 = vst [vmem:[#allocation61_spill] sm:$0xff] %v2934_v38  ;;  %v2938_v18 = vpop.permute.xlu0 %376 }
 0x174   :  { %1053 = vrot.lane.b32.xlu1 %v1019_v12, %s2374_s25 }
 0x175   :  { %1055 = vrot.lane.b32.xlu0 %v1020_v13, %s2374_s25  ;;  %v1015_v13 = vmul.f32 %v2750_v56, %v2685_v20 }
 0x176   :  { %v2944_v6 = vpop.permute.xlu1 %653 }
 0x177   :  { %4224 = vst [vmem:[#allocation62_spill] sm:$0xff] %v2944_v6  ;;  %v2948_v59 = vpop.permute.xlu0 %473 }
 0x178   :  { %839 = vrot.lane.b32.xlu1 %v815_v22, %s2372_s19  ;;  %v913_v22 = vmul.f32 %v2760_v5, %v2600_v14 }
 0x179   :  { %845 = vrot.lane.b32.xlu0 %v818_v32, %s2372_s19 }
 0x17a   :  { %v2955_v12 = vpop.permute.xlu1 %750 }
 0x17b   :  { %4225 = vst [vmem:[#allocation63_spill] sm:$0xff] %v2955_v12  ;;  %v2959_v41 = vpop.permute.xlu0 %570 }
 0x17c   :  { %1045 = vrot.lane.b32.xlu1 %v1015_v13, %s2374_s25  ;;  %v916_v13 = vmul.f32 %v2774_v43, %v2646_v1  ;;  %v1014_v43 = vmul.f32 %v2790_v3, %v2746_v53 }
 0x17d   :  { %1051 = vrot.lane.b32.xlu0 %v1018_v40, %s2374_s25 }
 0x17e   :  { %v2965_v21 = vpop.permute.xlu1 %366 }
 0x17f   :  { %v2969_v32 = vpop.permute.xlu0 %360 }
 0x180   :  { %4226 = vst [vmem:[#allocation64_spill] sm:$0xff] %v2969_v32  ;;  %938 = vrot.lane.b32.xlu1 %v913_v22, %s2373_s20  ;;  %v45_v22 = vld [vmem:[%s4053_s5] sm:$0xff] }
 0x181   :  { %940 = vrot.lane.b32.xlu0 %v914_v45, %s2373_s20  ;;  %v46_v45 = vld [vmem:[%s4053_s5 + $0x8] sm:$0xff] }
 0x182   :  { %v2975_v56 = vpop.permute.xlu1 %463 }
 0x183   :  { %v2979_v40 = vpop.permute.xlu0 %667 }
 0x184   :  { %944 = vrot.lane.b32.xlu1 %v916_v13, %s2373_s20  ;;  %v912_v13 = vmul.f32 %v2760_v5, %v2567_v60 }
 0x185   :  { %946 = vrot.lane.b32.xlu0 %v917_v42, %s2373_s20 }
 0x186   :  { %v2988_v30 = vpop.permute.xlu1 %560 }
 0x187   :  { %v2993_v35 = vpop.permute.xlu0 %457 }
 0x188   :  { %4227 = vst [vmem:[#allocation65_spill] sm:$0xff] %v2993_v35  ;;  %1092 = vperm.xlu1 %2335, %v45_v22   ;;  %v1010_v22 = vmul.f32 %v2551_v46, %v2600_v14 }
 0x189   :  { %1097 = vperm.xlu0 %2333, %v46_v45  }
 0x18a   :  { %v2995_v33 = vpop.permute.xlu1 %657 }
 0x18b   :  { %v2999_v42 = vpop.permute.xlu0 %764 }
 0x18c   :  { %936 = vrot.lane.b32.xlu1 %v912_v13, %s2373_s20  ;;  %v1013_v13 = vmul.f32 %v2790_v3, %v2646_v1 }
 0x18d   :  { %942 = vrot.lane.b32.xlu0 %v915_v54, %s2373_s20 }
 0x18e   :  { %v3005_v25 = vpop.permute.xlu1 %754 }
 0x18f   :  { %v3009_v45 = vpop.permute.xlu0 %554 }
 0x190   :  { %4228 = vst [vmem:[#allocation66_spill] sm:$0xff] %v3009_v45  ;;  %1035 = vrot.lane.b32.xlu1 %v1010_v22, %s2374_s25  ;;  %v1009_v22 = vmul.f32 %v2551_v46, %v2567_v60 }
 0x191   :  { %1037 = vrot.lane.b32.xlu0 %v1011_v27, %s2374_s25 }
 0x192   :  { %v3015_v5 = vpop.permute.xlu1 %851 }
 0x193   :  { %v3019_v54 = vpop.permute.xlu0 %861 }
 0x194   :  { %1041 = vrot.lane.b32.xlu1 %v1013_v13, %s2374_s25 }
 0x195   :  { %1043 = vrot.lane.b32.xlu0 %v1014_v43, %s2374_s25  ;;  %v4231_v43 = vmov 0.0  }
 0x196   :  { %v3025_v57 = vpop.permute.xlu1 %368  ;;  %2272 = vmatprep.mubr.msk.bf16.mxu0 %vm2376_vm1, %v4231_v43 }
 0x197   :  { %v3029_v27 = vpop.permute.xlu0 %651  ;;  %v384_v14 = vsel %vm378_vm2, %v3025_v57, %v2828_v8 }
 0x198   :  { %4229 = vst [vmem:[#allocation67_spill] sm:$0xff] %v3029_v27  ;;  %1033 = vrot.lane.b32.xlu1 %v1009_v22, %s2374_s25 }
 0x199   :  { %1039 = vrot.lane.b32.xlu0 %v1012_v52, %s2374_s25 }
 0x19a   :  { %v3035_v12 = vpop.permute.xlu1 %465 }
 0x19b   :  { %v3037_v6 = vpop.permute.xlu0 %364 }
 0x19c   :  { %4230 = vst [vmem:[#allocation68_spill] sm:$0xff] %v3037_v6 }
 0x19e   :  { %v3039_v13 = vpop.permute.xlu1 %562 }
 0x19f   :  { %v3043_v46 = vpop.permute.xlu0 %461 }
 0x1a0   :  { %4232 = vst [vmem:[#allocation69_spill] sm:$0xff] %v3043_v46 }
 0x1a2   :  { %v3045_v27 = vpop.permute.xlu1 %659 }
 0x1a3   :  { %v3047_v45 = vpop.permute.xlu0 %558 }
 0x1a4   :  { %4233 = vst [vmem:[#allocation70_spill] sm:$0xff] %v3047_v45 }
 0x1a6   :  { %v3049_v3 = vpop.permute.xlu1 %756 }
 0x1a7   :  { %v3051_v22 = vpop.permute.xlu0 %655 }
 0x1a8   :  { %4234 = vst [vmem:[#allocation71_spill] sm:$0xff] %v3051_v22 }
 0x1aa   :  { %v3053_v52 = vpop.permute.xlu1 %853 }
 0x1ab   :  { %v3055_v38 = vpop.permute.xlu0 %372 }
 0x1ae   :  { %v3057_v35 = vpop.permute.xlu1 %374 }
 0x1af   :  { %v3059_v63 = vpop.permute.xlu0 %469  ;;  %v386_v23 = vsel %vm378_vm2, %v3057_v35, %v2938_v18 }
 0x1b2   :  { %v3061_v36 = vpop.permute.xlu1 %471 }
 0x1b3   :  { %v3063_v34 = vpop.permute.xlu0 %566 }
 0x1b6   :  { %v3065_v2 = vpop.permute.xlu1 %568 }
 0x1b7   :  { %v3067_v46 = vpop.permute.xlu0 %663 }
 0x1ba   :  { %v3069_v45 = vpop.permute.xlu1 %665 }
 0x1bb   :  { %v3071_v32 = vpop.permute.xlu0 %760 }
 0x1be   :  { %v3073_v22 = vpop.permute.xlu1 %762 }
 0x1bf   :  { %v3075_v31 = vpop.permute.xlu0 %857 }
 0x1c2   :  { %v3077_v29 = vpop.permute.xlu1 %859 }
 0x1c3   :  { %v3079_v1 = vpop.permute.xlu0 %752 }
 0x1c4   :  { %4235 = vst [vmem:[#allocation72_spill] sm:$0xff] %v3079_v1  ;;  %v407_v1 = vadd.f32 %v2828_v8, %v298_v50  ;;  %v410_v50 = vadd.f32 %v2938_v18, %v301_v61  ;;  %v406_v8 = vadd.f32 %v384_v14, %v297_v24  ;;  %v300_v14 = vmul.f32 %v2802_v15, %v2788_v58 }
 0x1c5   :  { %v483_v18 = vsel %vm475_vm3, %v3061_v36, %v2948_v59 }
 0x1c6   :  { %v3081_v9 = vpop.permute.xlu1 %950  ;;  %v504_v62 = vadd.f32 %v2838_v44, %v407_v1  ;;  %v578_v1 = vsel %vm572_vm4, %v3039_v13, %v2848_v10  ;;  %v409_v58 = vadd.f32 %v386_v23, %v300_v14  ;;  %v480_v14 = vsel %vm475_vm3, %v2975_v56, %v3035_v12 }
 0x1c7   :  { %v3083_v6 = vpop.permute.xlu0 %952  ;;  %v385_v56 = vsel %vm378_vm2, %v3055_v38, %v3057_v35  ;;  %v482_v35 = vsel %vm475_vm3, %v3059_v63, %v3061_v36  ;;  %v871_v38 = vsel %vm863_vm7, %v3077_v29, %v3019_v54 }
 0x1c8   :  { %v601_v11 = vadd.f32 %v2848_v10, %v504_v62  ;;  %v675_v62 = vsel %vm669_vm5, %v3045_v27, %v2858_v55  ;;  %v299_v10 = vmul.f32 %v2802_v15, %v2781_v51  ;;  %v772_v51 = vsel %vm766_vm6, %v3049_v3, %v2868_v7 }
 0x1c9   :  { %v506_v23 = vadd.f32 %v483_v18, %v409_v58 }
 0x1ca   :  { %v3085_v48 = vpop.permute.xlu1 %956  ;;  %v698_v24 = vadd.f32 %v2858_v55, %v601_v11  ;;  %v383_v55 = vsel %vm378_vm2, %v2965_v21, %v3025_v57  ;;  %v869_v57 = vsel %vm863_vm7, %v3053_v52, %v2882_v28  ;;  %v677_v21 = vsel %vm669_vm5, %v3069_v45, %v2979_v40 }
 0x1cb   :  { %v3087_v37 = vpop.permute.xlu0 %958 }
 0x1cc   :  { %v795_v11 = vadd.f32 %v2868_v7, %v698_v24  ;;  %v405_v24 = vadd.f32 %v383_v55, %v296_v39  ;;  %v968_v63 = vsel %vm960_vm8, %v3085_v48, %v3087_v37 }
 0x1ce   :  { %v502_v39 = vadd.f32 %v480_v14, %v405_v24  ;;  %v773_v24 = vsel %vm766_vm6, %v3071_v32, %v3073_v22 }
 0x1d7   :  { %v3089_v47 = vpop.permute.xlu1 %1102 }
 0x1d8   :  { %v3091_v53 = vpop.permute.xlu0 %1107 }
 0x1db   :  { %v3095_v0 = vpop.permute.xlu1 %742 }
 0x1dc   :  { %4236 = vst [vmem:[#allocation73_spill] sm:$0xff] %v3095_v0  ;;  %v3097_v26 = vpop.permute.xlu0 %748  ;;  %v481_v0 = vsel %vm475_vm3, %v3035_v12, %v2838_v44  ;;  %v507_v44 = vadd.f32 %v2948_v59, %v410_v50  ;;  %v580_v59 = vsel %vm572_vm4, %v3065_v2, %v2959_v41  ;;  %v966_v12 = vsel %vm960_vm8, %v3081_v9, %v3083_v6 }
 0x1dd   :  { %4237 = vst [vmem:[#allocation74_spill] sm:$0xff] %v3097_v26  ;;  %v503_v61 = vadd.f32 %v481_v0, %v406_v8  ;;  %v603_v18 = vadd.f32 %v580_v59, %v506_v23  ;;  %v408_v59 = vadd.f32 %v385_v56, %v299_v10 }
 0x1de   :  { %v604_v0 = vadd.f32 %v2959_v41, %v507_v44 }
 0x1df   :  { %v3111_v26 = vpop.permute.xlu1 %948  ;;  %v600_v20 = vadd.f32 %v578_v1, %v503_v61  ;;  %v892_v61 = vadd.f32 %v2882_v28, %v795_v11  ;;  %v774_v28 = vsel %vm766_vm6, %v3073_v22, %v2999_v42  ;;  %v700_v58 = vadd.f32 %v677_v21, %v603_v18 }
 0x1e0   :  { %v3114_v17 = vpop.permute.xlu0 %954  ;;  %v701_v1 = vadd.f32 %v2979_v40, %v604_v0  ;;  %v577_v11 = vsel %vm572_vm4, %v2988_v30, %v3039_v13  ;;  %v579_v30 = vsel %vm572_vm4, %v3063_v34, %v3065_v2  ;;  %v505_v13 = vadd.f32 %v482_v35, %v408_v59 }
 0x1e1   :  { %v697_v44 = vadd.f32 %v675_v62, %v600_v20  ;;  %v771_v34 = vsel %vm766_vm6, %v3005_v25, %v3049_v3 }
 0x1e2   :  { %v798_v7 = vadd.f32 %v2999_v42, %v701_v1  ;;  %v989_v42 = vadd.f32 %v3083_v6, %v892_v61  ;;  %v797_v1 = vadd.f32 %v774_v28, %v700_v58  ;;  %v602_v2 = vadd.f32 %v579_v30, %v505_v13  ;;  %v4239_v13 = vld [vmem:[#allocation47_spill] sm:$0xff] }
 0x1e3   :  { %v3137_v50 = vpop.permute.xlu1 %841  ;;  %v794_v62 = vadd.f32 %v772_v51, %v697_v44  ;;  %v674_v51 = vsel %vm669_vm5, %v2995_v33, %v3045_v27  ;;  %v676_v33 = vsel %vm669_vm5, %v3067_v46, %v3069_v45  ;;  %v870_v28 = vsel %vm863_vm7, %v3075_v31, %v3077_v29 }
 0x1e4   :  { %v3140_v8 = vpop.permute.xlu0 %843  ;;  %v895_v40 = vadd.f32 %v3019_v54, %v798_v7  ;;  %v599_v54 = vadd.f32 %v577_v11, %v502_v39  ;;  %v894_v61 = vadd.f32 %v871_v38, %v797_v1  ;;  %v699_v45 = vadd.f32 %v676_v33, %v602_v2 }
 0x1e5   :  { %v891_v20 = vadd.f32 %v869_v57, %v794_v62 }
 0x1e6   :  { %v992_v27 = vadd.f32 %v3087_v37, %v895_v40  ;;  %v696_v57 = vadd.f32 %v674_v51, %v599_v54  ;;  %v991_v21 = vadd.f32 %v968_v63, %v894_v61  ;;  %v868_v37 = vsel %vm863_vm7, %v3015_v5, %v3053_v52  ;;  %v4238_v54 = vld [vmem:[#allocation50_spill] sm:$0xff] }
 0x1e7   :  { %v3163_v41 = vpop.permute.xlu1 %847  ;;  %v988_v44 = vadd.f32 %v966_v12, %v891_v20  ;;  %v796_v12 = vadd.f32 %v773_v24, %v699_v45  ;;  %v965_v40 = vsel %vm960_vm8, %v3111_v26, %v3081_v9  ;;  %v967_v20 = vsel %vm960_vm8, %v3114_v17, %v3085_v48  ;;  %v4244_v24 = vld [vmem:[#allocation48_spill] sm:$0xff] }
 0x1e8   :  { %v3166_v0 = vpop.permute.xlu0 %849  ;;  %v793_v3 = vadd.f32 %v771_v34, %v696_v57  ;;  %v379_v48 = vsel %vm378_vm2, %v2824_v4, %v2864_v49  ;;  %v476_v61 = vsel %vm475_vm3, %v4239_v13, %v4238_v54  ;;  %v4242_v34 = vld [vmem:[#allocation30_spill] sm:$0xff] }
 0x1e9   :  { %v893_v29 = vadd.f32 %v870_v28, %v796_v12 }
 0x1ea   :  { %v890_v52 = vadd.f32 %v868_v37, %v793_v3 }
 0x1eb   :  { %v1048_v55 = vpop.permute.xlu1 %1047  ;;  %v990_v59 = vadd.f32 %v967_v20, %v893_v29 }
 0x1ec   :  { %v1050_v23 = vpop.permute.xlu0 %1049  ;;  %v987_v38 = vadd.f32 %v965_v40, %v890_v52  ;;  %v4248_v40 = vld [vmem:[#allocation56_spill] sm:$0xff]  ;;  %v4249_v52 = vld [vmem:[#allocation37_spill] sm:$0xff] }
 0x1ed   :  { %v1086_v36 = vadd.f32 %v1050_v23, %v989_v42  ;;  %v1063_v6 = vsel %vm1057_vm9, %v1048_v55, %v1050_v23 }
 0x1ee   :  { %v1085_v14 = vadd.f32 %v1063_v6, %v988_v44 }
 0x1ef   :  { %v1054_v10 = vpop.permute.xlu1 %1053  ;;  %v1118_v62 = vadd.f32 %v3089_v47, %v1086_v36 }
 0x1f0   :  { %v1056_v7 = vpop.permute.xlu0 %1055  ;;  %v1117_v25 = vadd.f32 %v3089_v47, %v1085_v14  ;;  %v4240_v14 = vld [vmem:[#allocation32_spill] sm:$0xff] }
 0x1f1   :  { %v1089_v18 = vadd.f32 %v1056_v7, %v992_v27  ;;  %v1065_v46 = vsel %vm1057_vm9, %v1054_v10, %v1056_v7  ;;  %v1130_v58 = vmax.f32 %v1118_v62, 0.0  ;;  %v292_v33 = vmul.f32 %v2814_v19, %v4240_v14  ;;  %v4241_v27 = vld [vmem:[#allocation52_spill] sm:$0xff]  ;;  %v4243_v7 = vld [vmem:[#allocation51_spill] sm:$0xff] }
 0x1f2   :  { %v1088_v56 = vadd.f32 %v1065_v46, %v991_v21  ;;  %v1129_v11 = vmax.f32 %v1117_v25, 0.0  ;;  %v380_v4 = vsel %vm378_vm2, %v2864_v49, %v4241_v27  ;;  %v573_v62 = vsel %vm572_vm4, %v4244_v24, %v4243_v7  ;;  %v4247_v25 = vld [vmem:[#allocation46_spill] sm:$0xff] }
 0x1f3   :  { %v1121_v32 = vadd.f32 %v3091_v53, %v1089_v18  ;;  %v3218_v22 = vpop.permute.xlu1 %839  ;;  %v401_v21 = vadd.f32 %v4241_v27, %v292_v33  ;;  %v4245_v18 = vld [vmem:[#allocation54_spill] sm:$0xff]  ;;  %v293_v20 = vmul.f32 %v4247_v25, %v4249_v52 }
 0x1f4   :  { %v3223_v39 = vpop.permute.xlu0 %845  ;;  %v1120_v5 = vadd.f32 %v3091_v53, %v1088_v56  ;;  %v477_v46 = vsel %vm475_vm3, %v4238_v54, %v4245_v18  ;;  %v4246_v56 = vld [vmem:[#allocation41_spill] sm:$0xff] }
 0x1f5   :  { %v1133_v31 = vmax.f32 %v1121_v32, 0.0  ;;  %v295_v3 = vmul.f32 %v4247_v25, %v4246_v56  ;;  %v498_v12 = vadd.f32 %v4245_v18, %v401_v21  ;;  %v4263_v21 = vld [vmem:[#allocation61_spill] sm:$0xff] }
 0x1f6   :  { %v1132_v35 = vmax.f32 %v1120_v5, 0.0  ;;  %v574_v5 = vsel %vm572_vm4, %v4243_v7, %v4248_v40 }
 0x1f7   :  { %v1046_v42 = vpop.permute.xlu1 %1045  ;;  %v1139_v51 = vpack.c.bf16 %v1133_v31, %v1130_v58  ;;  %v4250_v58 = vld [vmem:[#allocation68_spill] sm:$0xff]  ;;  %v4251_v31 = vld [vmem:[#allocation57_spill] sm:$0xff] }
 0x1f8   :  { %v1052_v1 = vpop.permute.xlu0 %1051  ;;  %v1062_v26 = vsel %vm1057_vm9, %v1046_v42, %v1048_v55  ;;  %v1138_v9 = vpack.c.bf16 %v1132_v35, %v1129_v11  ;;  %v290_v55 = vmul.f32 %v2814_v19, %v2567_v60  ;;  %v291_v60 = vmul.f32 %v2814_v19, %v4242_v34  ;;  %v4261_v34 = vld [vmem:[#allocation65_spill] sm:$0xff] }
 0x1f9   :  { %v1064_v44 = vsel %vm1057_vm9, %v1052_v1, %v1054_v10  ;;  %v1084_v23 = vadd.f32 %v1062_v26, %v987_v38  ;;  %2269 = vmatpush3.bf16.msra.mxu0 %v1139_v51  ;;  %v382_v29 = vsel %vm378_vm2, %v4251_v31, %v4250_v58  ;;  %v4252_v38 = vld [vmem:[#allocation36_spill] sm:$0xff]  ;;  %v404_v51 = vadd.f32 %v4250_v58, %v295_v3  ;;  %v4253_v1 = vld [vmem:[#allocation58_spill] sm:$0xff]  ;;  %v4254_v26 = vld [vmem:[#allocation53_spill] sm:$0xff] }
 0x1fa   :  { %v1087_v30 = vadd.f32 %v1064_v44, %v990_v59  ;;  %1170 = vmatprep.subr.bf16.mxu1 %v1138_v9  ;;  %2270 = vmatprep.subr.bf16.mxu0 %v4231_v43  ;;  %v399_v57 = vadd.f32 %v379_v48, %v290_v55  ;;  %v400_v49 = vadd.f32 %v380_v4, %v291_v60  ;;  %v4255_v44 = vld [vmem:[#allocation64_spill] sm:$0xff]  ;;  %v4257_v48 = vld [vmem:[#allocation59_spill] sm:$0xff] }
 0x1fb   :  { %v1116_v17 = vadd.f32 %v3089_v47, %v1084_v23  ;;  %v3236_v63 = vpop.permute.xlu1 %938  ;;  %v294_v42 = vmul.f32 %v4247_v25, %v4252_v38  ;;  %v595_v59 = vadd.f32 %v4248_v40, %v498_v12  ;;  %v671_v9 = vsel %vm669_vm5, %v4254_v26, %v4253_v1  ;;  %v4259_v4 = vld [vmem:[#allocation60_spill] sm:$0xff]  ;;  %v4265_v3 = vld [vmem:[#allocation71_spill] sm:$0xff] }
 0x1fc   :  { %v1119_v36 = vadd.f32 %v3091_v53, %v1087_v30  ;;  %v3241_v6 = vpop.permute.xlu0 %940  ;;  %v496_v45 = vadd.f32 %v476_v61, %v399_v57  ;;  %v497_v35 = vadd.f32 %v477_v46, %v400_v49  ;;  %v381_v23 = vsel %vm378_vm2, %v4255_v44, %v4251_v31  ;;  %v4256_v30 = vld [vmem:[#allocation69_spill] sm:$0xff]  ;;  %v4264_v49 = vld [vmem:[#allocation66_spill] sm:$0xff]  ;;  %v4267_v38 = vld [vmem:[#allocation72_spill] sm:$0xff] }
 0x1fd   :  { %v1128_v10 = vmax.f32 %v1116_v17, 0.0  ;;  %v479_v17 = vsel %vm475_vm3, %v4257_v48, %v4256_v30  ;;  %v403_v61 = vadd.f32 %v382_v29, %v294_v42  ;;  %v501_v14 = vadd.f32 %v4256_v30, %v404_v51  ;;  %v4268_v42 = vld [vmem:[#allocation63_spill] sm:$0xff] }
 0x1fe   :  { %v1131_v2 = vmax.f32 %v1119_v36, 0.0  ;;  %v593_v11 = vadd.f32 %v573_v62, %v496_v45  ;;  %v4258_v36 = vld [vmem:[#allocation49_spill] sm:$0xff]  ;;  %v594_v13 = vadd.f32 %v574_v5, %v497_v35  ;;  %v692_v27 = vadd.f32 %v4253_v1, %v595_v59  ;;  %v4269_v30 = vld [vmem:[#allocation67_spill] sm:$0xff] }
 0x1ff   :  { %v3260_v37 = vpop.permute.xlu1 %944  ;;  %v670_v54 = vsel %vm669_vm5, %v4258_v36, %v4254_v26  ;;  %v478_v60 = vsel %vm475_vm3, %v4261_v34, %v4257_v48  ;;  %v402_v62 = vadd.f32 %v381_v23, %v293_v20  ;;  %v500_v18 = vadd.f32 %v479_v17, %v403_v61  ;;  %v4271_v61 = vld [vmem:[#allocation74_spill] sm:$0xff] }
 0x200   :  { %v1137_v28 = vpack.c.bf16 %v1131_v2, %v1128_v10  ;;  %v3264_v32 = vpop.permute.xlu0 %946  ;;  %v4260_v10 = vld [vmem:[#allocation55_spill] sm:$0xff]  ;;  %v4262_v2 = vld [vmem:[#allocation70_spill] sm:$0xff]  ;;  %v691_v24 = vadd.f32 %v671_v9, %v594_v13  ;;  %v789_v45 = vadd.f32 %v4259_v4, %v692_v27  ;;  %v575_v56 = vsel %vm572_vm4, %v4264_v49, %v4263_v21 }
 0x201   :  { %v768_v57 = vsel %vm766_vm6, %v4260_v10, %v4259_v4  ;;  %v576_v7 = vsel %vm572_vm4, %v4263_v21, %v4262_v2  ;;  %v598_v46 = vadd.f32 %v4262_v2, %v501_v14  ;;  %v865_v40 = vsel %vm863_vm7, %v3137_v50, %v3140_v8 }
 0x202   :  { %1171 = vmatpush1.bf16.msra.mxu1 %v1137_v28  ;;  %v4266_v28 = vld [vmem:[#allocation62_spill] sm:$0xff]  ;;  %v788_v52 = vadd.f32 %v768_v57, %v691_v24  ;;  %v499_v20 = vadd.f32 %v478_v60, %v402_v62  ;;  %v597_v58 = vadd.f32 %v576_v7, %v500_v18  ;;  %v690_v35 = vadd.f32 %v670_v54, %v593_v11  ;;  %v4270_v11 = vld [vmem:[#allocation73_spill] sm:$0xff] }
 0x203   :  { %v3288_v55 = vpop.permute.xlu1 %1092  ;;  %v673_v12 = vsel %vm669_vm5, %v4266_v28, %v4265_v3  ;;  %v695_v31 = vadd.f32 %v4265_v3, %v598_v46  ;;  %v770_v51 = vsel %vm766_vm6, %v4268_v42, %v4267_v38  ;;  %v886_v59 = vadd.f32 %v3140_v8, %v789_v45 }
 0x204   :  { %v3294_v33 = vpop.permute.xlu0 %1097  ;;  %v962_v1 = vsel %vm960_vm8, %v3236_v63, %v3241_v6  ;;  %v596_v26 = vadd.f32 %v575_v56, %v499_v20  ;;  %v694_v9 = vadd.f32 %v673_v12, %v597_v58  ;;  %v885_v23 = vadd.f32 %v865_v40, %v788_v52 }
 0x205   :  { %v792_v44 = vadd.f32 %v4267_v38, %v695_v31  ;;  %v672_v48 = vsel %vm669_vm5, %v4269_v30, %v4266_v28  ;;  %v767_v17 = vsel %vm766_vm6, %v4270_v11, %v4260_v10  ;;  %v867_v8 = vsel %vm863_vm7, %v3163_v41, %v3166_v0  ;;  %v2346_v30 = vld [vmem:[%s4054_s6] sm:$0xff]  }
 0x206   :  { %v983_v36 = vadd.f32 %v3241_v6, %v886_v59  ;;  %v791_v13 = vadd.f32 %v770_v51, %v694_v9  ;;  %v769_v14 = vsel %vm766_vm6, %v4271_v61, %v4268_v42  ;;  %v982_v4 = vadd.f32 %v962_v1, %v885_v23  ;;  %v2347_v1 = vld [vmem:[%s4049_s0 + $0x50] ss:$12 sps:$4 sm:$0xff]   ;;  %v2354_v61 = vld [vmem:[%s4049_s0 + $0x34] ss:$12 sps:$4 sm:$0xff]  }
 0x207   :  { %v937_v5 = vpop.permute.xlu1 %936  ;;  %v889_v27 = vadd.f32 %v3166_v0, %v792_v44  ;;  %v864_v10 = vsel %vm863_vm7, %v3218_v22, %v3137_v50  ;;  %v964_v34 = vsel %vm960_vm8, %v3260_v37, %v3264_v32  ;;  %v693_v2 = vadd.f32 %v672_v48, %v596_v26 }
 0x208   :  { %v943_v29 = vpop.permute.xlu0 %942  ;;  %v787_v21 = vadd.f32 %v767_v17, %v690_v35  ;;  %v888_v7 = vadd.f32 %v867_v8, %v791_v13  ;;  %v866_v0 = vsel %vm863_vm7, %v3223_v39, %v3163_v41  ;;  %v961_v45 = vsel %vm960_vm8, %v937_v5, %v3236_v63  ;;  %v2348_v17 = vld [vmem:[%s4049_s0 + $0x38] ss:$12 sps:$4 sm:$0xff]   ;;  %v2349_v13 = vld [vmem:[%s4049_s0 + $0x48] ss:$12 sps:$4 sm:$0xff]  }
 0x209   :  { %v986_v62 = vadd.f32 %v3264_v32, %v889_v27  ;;  %v790_v46 = vadd.f32 %v769_v14, %v693_v2  ;;  %v963_v56 = vsel %vm960_vm8, %v943_v29, %v3260_v37  ;;  %v2351_v8 = vld [vmem:[%s4049_s0 + $0x4c] ss:$12 sps:$4 sm:$0xff]   ;;  %v2352_v14 = vld [vmem:[%s4049_s0 + $0x30] ss:$12 sps:$4 sm:$0xff]   ;;  %v4272_v27 = vmov 0  }
 0x20a   :  { %v884_v50 = vadd.f32 %v864_v10, %v787_v21  ;;  %v985_v22 = vadd.f32 %v964_v34, %v888_v7  ;;  %v4277_v7 = vld [vmem:[#allocation23_spill] sm:$0xff] }
 0x20b   :  { %v1036_v54 = vpop.permute.xlu1 %1035  ;;  %v887_v40 = vadd.f32 %v866_v0, %v790_v46  ;;  %v4279_v46 = vld [vmem:[#allocation25_spill] sm:$0xff] }
 0x20c   :  { %v1038_v57 = vpop.permute.xlu0 %1037  ;;  %v981_v32 = vadd.f32 %v961_v45, %v884_v50  ;;  %v4280_v45 = vld [vmem:[#allocation4_spill] sm:$0xff] }
 0x20d   :  { %v1080_v60 = vadd.f32 %v1038_v57, %v983_v36  ;;  %v1059_v6 = vsel %vm1057_vm9, %v1036_v54, %v1038_v57  ;;  %v984_v58 = vadd.f32 %v963_v56, %v887_v40  ;;  %v4281_v56 = vld [vmem:[#allocation2_spill] sm:$0xff] }
 0x20e   :  { %v1079_v24 = vadd.f32 %v1059_v6, %v982_v4  ;;  %v2356_v4 = vld [vmem:[%s4050_s2 + $0x8] sm:$0xff]  }
 0x20f   :  { %v1042_v18 = vpop.permute.xlu1 %1041  ;;  %v1112_v3 = vadd.f32 %v3288_v55, %v1080_v60 }
 0x210   :  { %v1044_v49 = vpop.permute.xlu0 %1043  ;;  %v1111_v39 = vadd.f32 %v3288_v55, %v1079_v24 }
 0x211   :  { %v1083_v28 = vadd.f32 %v1044_v49, %v986_v62  ;;  %v1061_v12 = vsel %vm1057_vm9, %v1042_v18, %v1044_v49  ;;  %v1124_v37 = vmax.f32 %v1112_v3, 0.0 }
 0x212   :  { %v1082_v41 = vadd.f32 %v1061_v12, %v985_v22  ;;  %v1123_v51 = vmax.f32 %v1111_v39, 0.0  ;;  %v4282_v12 = vld [vmem:[#allocation24_spill] sm:$0xff] }
 0x213   :  { %v1115_v52 = vadd.f32 %v3294_v33, %v1083_v28  ;;  %v1034_v20 = vpop.permute.xlu1 %1033 }
 0x214   :  { %v1040_v31 = vpop.permute.xlu0 %1039  ;;  %v1058_v63 = vsel %vm1057_vm9, %v1034_v20, %v1036_v54  ;;  %v1114_v5 = vadd.f32 %v3294_v33, %v1082_v41  ;;  %v2355_v54 = vld [vmem:[%s4050_s2] sm:$0xff]   ;;  %v4285_v20 = vld [vmem:[#allocation7_spill] sm:$0xff] }
 0x215   :  { %v1127_v29 = vmax.f32 %v1115_v52, 0.0  ;;  %v1060_v35 = vsel %vm1057_vm9, %v1040_v31, %v1042_v18  ;;  %v1078_v38 = vadd.f32 %v1058_v63, %v981_v32  ;;  %v4283_v41 = vld [vmem:[#allocation10_spill] sm:$0xff]  ;;  %v4284_v32 = vld [vmem:[#allocation12_spill] sm:$0xff] }
 0x216   :  { %v1081_v42 = vadd.f32 %v1060_v35, %v984_v58  ;;  %v1126_v59 = vmax.f32 %v1114_v5, 0.0  ;;  %v4286_v31 = vld [vmem:[#allocation18_spill] sm:$0xff]  ;;  %v4287_v5 = vld [vmem:[#allocation20_spill] sm:$0xff] }
 0x217   :  { %v1110_v26 = vadd.f32 %v3288_v55, %v1078_v38  ;;  %v1136_v9 = vpack.c.bf16 %v1127_v29, %v1124_v37  ;;  %v4288_v29 = vld [vmem:[#allocation9_spill] sm:$0xff]  ;;  %v4289_v38 = vld [vmem:[#allocation27_spill] sm:$0xff] }
 0x218   :  { %v1113_v44 = vadd.f32 %v3294_v33, %v1081_v42  ;;  %v1135_v23 = vpack.c.bf16 %v1126_v59, %v1123_v51  ;;  %v4290_v59 = vld [vmem:[#allocation29_spill] sm:$0xff] }
 0x219   :  { %v1122_v48 = vmax.f32 %v1110_v26, 0.0  ;;  %2271 = vmatpush3.bf16.msra.mxu0 %v1136_v9 }
 0x21a   :  { %v1125_v11 = vmax.f32 %v1113_v44, 0.0  ;;  %1172 = vmatprep.subr.bf16.mxu1 %v1135_v23  ;;  %2276 = vmatprep.subr.bf16.mxu0 %v2347_v1  ;;  %v4291_v44 = vld [vmem:[#allocation15_spill] sm:$0xff] }
 0x21c   :  { %v1134_v36 = vpack.c.bf16 %v1125_v11, %v1122_v48  ;;  %2273 = vmatmul.mubr.msk.bf16.vlgmr.msra.gmra.mxu0 %vm121_vm0, %v2346_v30  ;;  %v4292_v48 = vld [vmem:[#allocation34_spill] sm:$0xff] }
 0x21d   :  { %2277 = vmatpush3.bf16.msra.mxu0 %v2347_v1  ;;  %2280 = vmatprep.mubr.msk.bf16.mxu0 %vm121_vm0, %v2355_v54 }
 0x21e   :  { %1173 = vmatpush1.bf16.msra.mxu1 %v1134_v36  ;;  %2278 = vmatprep.subr.bf16.mxu0 %v2348_v17 }
 0x21f   :  { %1302 = vmatprep.subr.bf16.mxu1 %v2351_v8  ;;  %v4293_v8 = vld [vmem:[#allocation38_spill] sm:$0xff] }
 0x221   :  { %2218 = vmatmul.mubr.msk.bf16.vlgmr.msra.gmra.mxu1 %vm121_vm0, %v2346_v30  ;;  %2279 = vmatpush3.bf16.msra.mxu0 %v2348_v17 }
 0x222   :  { %1303 = vmatpush1.bf16.msra.mxu1 %v2349_v13  ;;  %1322 = vmatprep.mubr.bf16.mxu1 %v4272_v27  ;;  %v4294_v13 = vld [vmem:[#allocation17_spill] sm:$0xff] }
 0x223   :  { %1304 = vmatprep.subr.bf16.mxu1 %v2354_v61 }
 0x224   :  { %2281 = vmatmul.mubr.msk.bf16.vlgmr.msra.gmra.mxu0 %vm121_vm0, %v2356_v4 }
 0x225   :  { %2142 = vmatprep.mubr.bf16.mxu0 %v4272_v27 }
 0x226   :  { %1305 = vmatpush1.bf16.msra.mxu1 %v2352_v14 }
 0x227   :  { %2284 = vmatprep.subr.bf16.mxu1 %v4231_v43 }
 0x229   :  { %2234 = vmatmul.mubr.msk.bf16.vlgmr.msra.gmra.mxu1 %vm121_vm0, %v2355_v54 }
 0x22a   :  { %1332 = vmatprep.mubr.bf16.mxu1 %v4272_v27  ;;  %v4295_v27 = vld [vmem:[#allocation42_spill] sm:$0xff] }
 0x231   :  { %2235 = vmatmul.mubr.msk.bf16.gmra.mxu1 %vm121_vm0, %v2356_v4 }
 0x232   :  { %2288 = vmatprep.mubr.msk.bf16.mxu1 %vm2376_vm1, %v4231_v43 }
 0x2dc   :  { %v3403_v57 = vpop.f32.mrf.mxu0 }
 0x2dd   :  { %4273 = vst [vmem:[#allocation50_spill] sm:$0xff] %v3403_v57 }
 0x2de   :  { %v2274_v10 = vpop.f32.mrf.mxu0 }
 0x2df   :  { %v4296_v10 = vld [vmem:[#allocation28_spill] sm:$0xff] }
 0x2e0   :  { %v3405_v34 = vpop.f32.mrf.mxu0 }
 0x2e1   :  { %4274 = vst [vmem:[#allocation47_spill] sm:$0xff] %v3405_v34  ;;  %v3407_v60 = vpop.f32.mrf.mxu1 }
 0x2e2   :  { %4275 = vst [vmem:[#allocation32_spill] sm:$0xff] %v3407_v60  ;;  %v2275_v6 = vpop.f32.mrf.mxu0 }
 0x2e3   :  { %v3409_v2 = vpop.f32.mrf.mxu1 }
 0x2e4   :  { %4276 = vst [vmem:[#allocation52_spill] sm:$0xff] %v3409_v2  ;;  %v2282_v21 = vpop.f32.mrf.mxu0 }
 0x2e5   :  { %v1386_v24 = vadd.f32 %v2282_v21, %v4277_v7  ;;  %v3412_v0 = vpop.f32.mrf.mxu1  ;;  %v4297_v21 = vld [vmem:[#allocation43_spill] sm:$0xff] }
 0x2e6   :  { %v1377_v51 = vpop.f32.mrf.mxu0 }
 0x2e7   :  { %v1400_v62 = vmax.f32 %v1386_v24, 0.0  ;;  %v3414_v18 = vpop.f32.mrf.mxu1  ;;  %v1378_v9 = vadd.f32 %v1377_v51, %v4280_v45  ;;  %v4299_v51 = vld [vmem:[#allocation6_spill] sm:$0xff] }
 0x2e8   :  { %4278 = vst [vmem:[#allocation30_spill] sm:$0xff] %v3414_v18 }
 0x2e9   :  { %v3417_v50 = vmul.f32 %v1400_v62, %v4279_v46  ;;  %v1324_v22 = vpop.f32.mrf.mxu1  ;;  %v1394_v17 = vmax.f32 %v1378_v9, 0.0 }
 0x2ea   :  { %v1325_v49 = vadd.f32 %v1324_v22, %v4280_v45 }
 0x2eb   :  { %v1448_v3 = vmul.f32 %v3417_v50, %v4281_v56  ;;  %v1528_v39 = vmul.f32 %v3417_v50, %v4283_v41  ;;  %v1608_v58 = vmul.f32 %v3417_v50, %v4285_v20  ;;  %v1688_v37 = vmul.f32 %v3417_v50, %v4287_v5  ;;  %v1326_v26 = vpop.f32.mrf.mxu1 }
 0x2ec   :  { %v1392_v28 = vmax.f32 %v1325_v49, 0.0  ;;  %v1768_v42 = vmul.f32 %v3417_v50, %v4289_v38  ;;  %v1848_v23 = vmul.f32 %v3417_v50, %v4291_v44  ;;  %v1327_v30 = vadd.f32 %v1326_v26, %v4280_v45 }
 0x2ed   :  { %1480 = vrot.lane.b32.xlu0 %v1448_v3, %s2367_s1  ;;  %v1928_v36 = vmul.f32 %v3417_v50, %v4293_v8  ;;  %v3465_v14 = vmul.f32 %v1394_v17, %v4279_v46  ;;  %v2008_v4 = vmul.f32 %v3417_v50, %v4295_v27 }
 0x2ee   :  { %v3424_v40 = vmul.f32 %v1392_v28, %v4282_v12  ;;  %v1393_v54 = vmax.f32 %v1327_v30, 0.0 }
 0x2ef   :  { %v1442_v62 = vmul.f32 %v3465_v14, %v4284_v32  ;;  %v1522_v45 = vmul.f32 %v3465_v14, %v4286_v31  ;;  %v1602_v3 = vmul.f32 %v3465_v14, %v4288_v29  ;;  %v1922_v9 = vmul.f32 %v3465_v14, %v4297_v21 }
 0x2f0   :  { %v1440_v52 = vmul.f32 %v3424_v40, %v4284_v32  ;;  %v1520_v63 = vmul.f32 %v3424_v40, %v4286_v31  ;;  %v1600_v35 = vmul.f32 %v3424_v40, %v4288_v29  ;;  %v1680_v1 = vmul.f32 %v3424_v40, %v4290_v59 }
 0x2f1   :  { %1560 = vrot.lane.b32.xlu0 %v1528_v39, %s2368_s15  ;;  %v1760_v11 = vmul.f32 %v3424_v40, %v4292_v48  ;;  %v1840_v61 = vmul.f32 %v3424_v40, %v4294_v13  ;;  %v3470_v6 = vmul.f32 %v1393_v54, %v4296_v10  ;;  %v1920_v24 = vmul.f32 %v3424_v40, %v4297_v21 }
 0x2f2   :  { %1464 = vrot.lane.b32.xlu1 %v1440_v52, %s2367_s1  ;;  %v1682_v39 = vmul.f32 %v3465_v14, %v4290_v59  ;;  %v3498_v52 = vpop.f32.mrf.mxu1 }
 0x2f3   :  { %v1441_v22 = vmul.f32 %v3470_v6, %v4284_v32  ;;  %v1521_v49 = vmul.f32 %v3470_v6, %v4286_v31  ;;  %v1601_v28 = vmul.f32 %v3470_v6, %v4288_v29  ;;  %v1681_v32 = vmul.f32 %v3470_v6, %v4290_v59  ;;  %v2283_v31 = vpop.f32.mrf.mxu0  ;;  %v4298_v29 = vld [vmem:[#allocation35_spill] sm:$0xff] }
 0x2f4   :  { %v1921_v30 = vmul.f32 %v3470_v6, %v4297_v21 }
 0x2f5   :  { %1640 = vrot.lane.b32.xlu0 %v1608_v58, %s2369_s16  ;;  %v1762_v58 = vmul.f32 %v3465_v14, %v4292_v48 }
 0x2f6   :  { %1544 = vrot.lane.b32.xlu1 %v1520_v63, %s2368_s15  ;;  %v1761_v63 = vmul.f32 %v3470_v6, %v4292_v48 }
 0x2f9   :  { %1720 = vrot.lane.b32.xlu0 %v1688_v37, %s2370_s17  ;;  %v1330_v37 = vpop.f32.mrf.mxu1 }
 0x2fa   :  { %1624 = vrot.lane.b32.xlu1 %v1600_v35, %s2369_s16  ;;  %v1389_v35 = vadd.f32 %v2283_v31, %v4298_v29  ;;  %v1331_v59 = vadd.f32 %v1330_v37, %v4299_v51  ;;  %v4308_v31 = vld [vmem:[#allocation31_spill] sm:$0xff] }
 0x2fb   :  { %v1334_v37 = vpop.f32.mrf.mxu1 }
 0x2fc   :  { %v1403_v26 = vmax.f32 %v1389_v35, 0.0  ;;  %v4309_v35 = vld [vmem:[#allocation11_spill] sm:$0xff] }
 0x2fd   :  { %1800 = vrot.lane.b32.xlu0 %v1768_v42, %s2371_s18  ;;  %v1842_v42 = vmul.f32 %v3465_v14, %v4294_v13 }
 0x2fe   :  { %1704 = vrot.lane.b32.xlu1 %v1680_v1, %s2370_s17  ;;  %v1841_v1 = vmul.f32 %v3470_v6, %v4294_v13  ;;  %v3523_v48 = vmul.f32 %v1403_v26, %v4279_v46  ;;  %v4301_v13 = vld [vmem:[#allocation8_spill] sm:$0xff]  ;;  %v4310_v26 = vld [vmem:[#allocation13_spill] sm:$0xff] }
 0x301   :  { %1880 = vrot.lane.b32.xlu0 %v1848_v23, %s2372_s19  ;;  %v1396_v23 = vmax.f32 %v1331_v59, 0.0  ;;  %v1380_v59 = vpop.f32.mrf.mxu0 }
 0x302   :  { %1784 = vrot.lane.b32.xlu1 %v1760_v11, %s2371_s18  ;;  %v4300_v11 = vld [vmem:[#allocation21_spill] sm:$0xff] }
 0x303   :  { %v2002_v17 = vmul.f32 %v3465_v14, %v4300_v11  ;;  %v2001_v54 = vmul.f32 %v3470_v6, %v4300_v11 }
 0x305   :  { %1960 = vrot.lane.b32.xlu0 %v1928_v36, %s2373_s20  ;;  %v3528_v36 = vmul.f32 %v1396_v23, %v4296_v10  ;;  %v1381_v23 = vadd.f32 %v1380_v59, %v4299_v51 }
 0x306   :  { %1864 = vrot.lane.b32.xlu1 %v1840_v61, %s2372_s19  ;;  %v1451_v61 = vmul.f32 %v3523_v48, %v4301_v13 }
 0x309   :  { %2040 = vrot.lane.b32.xlu0 %v2008_v4, %s2374_s25  ;;  %v4302_v4 = vld [vmem:[#allocation14_spill] sm:$0xff] }
 0x30a   :  { %1944 = vrot.lane.b32.xlu1 %v1920_v24, %s2373_s20  ;;  %v1444_v21 = vmul.f32 %v3528_v36, %v4302_v4  ;;  %v4303_v24 = vld [vmem:[#allocation3_spill] sm:$0xff] }
 0x30d   :  { %1468 = vrot.lane.b32.xlu0 %v1442_v62, %s2367_s1  ;;  %v1531_v62 = vmul.f32 %v3523_v48, %v4303_v24 }
 0x30e   :  { %1466 = vrot.lane.b32.xlu1 %v1441_v22, %s2367_s1  ;;  %v4304_v22 = vld [vmem:[#allocation5_spill] sm:$0xff] }
 0x311   :  { %1548 = vrot.lane.b32.xlu0 %v1522_v45, %s2368_s15  ;;  %v1524_v45 = vmul.f32 %v3528_v36, %v4304_v22 }
 0x312   :  { %1546 = vrot.lane.b32.xlu1 %v1521_v49, %s2368_s15  ;;  %v4305_v49 = vld [vmem:[#allocation16_spill] sm:$0xff] }
 0x315   :  { %1628 = vrot.lane.b32.xlu0 %v1602_v3, %s2369_s16  ;;  %v1611_v3 = vmul.f32 %v3523_v48, %v4305_v49 }
 0x316   :  { %1626 = vrot.lane.b32.xlu1 %v1601_v28, %s2369_s16  ;;  %v4306_v28 = vld [vmem:[#allocation26_spill] sm:$0xff] }
 0x319   :  { %1708 = vrot.lane.b32.xlu0 %v1682_v39, %s2370_s17  ;;  %v1604_v39 = vmul.f32 %v3528_v36, %v4306_v28 }
 0x31a   :  { %1706 = vrot.lane.b32.xlu1 %v1681_v32, %s2370_s17  ;;  %v4307_v32 = vld [vmem:[#allocation22_spill] sm:$0xff] }
 0x31d   :  { %1788 = vrot.lane.b32.xlu0 %v1762_v58, %s2371_s18  ;;  %v1691_v58 = vmul.f32 %v3523_v48, %v4307_v32 }
 0x31e   :  { %1786 = vrot.lane.b32.xlu1 %v1761_v63, %s2371_s18  ;;  %v1684_v63 = vmul.f32 %v3528_v36, %v4308_v31 }
 0x321   :  { %1868 = vrot.lane.b32.xlu0 %v1842_v42, %s2372_s19  ;;  %v1771_v42 = vmul.f32 %v3523_v48, %v4309_v35 }
 0x322   :  { %1866 = vrot.lane.b32.xlu1 %v1841_v1, %s2372_s19  ;;  %v1335_v1 = vadd.f32 %v1334_v37, %v4277_v7 }
 0x325   :  { %1948 = vrot.lane.b32.xlu0 %v1922_v9, %s2373_s20  ;;  %v1764_v9 = vmul.f32 %v3528_v36, %v4310_v26 }
 0x326   :  { %1946 = vrot.lane.b32.xlu1 %v1921_v30, %s2373_s20  ;;  %v4311_v30 = vld [vmem:[#allocation33_spill] sm:$0xff] }
 0x329   :  { %2028 = vrot.lane.b32.xlu0 %v2002_v17, %s2374_s25  ;;  %v1851_v17 = vmul.f32 %v3523_v48, %v4311_v30 }
 0x32a   :  { %2026 = vrot.lane.b32.xlu1 %v2001_v54, %s2374_s25  ;;  %v1398_v54 = vmax.f32 %v1335_v1, 0.0 }
 0x32d   :  { %1486 = vrot.lane.b32.xlu0 %v1451_v61, %s2367_s1  ;;  %v4312_v61 = vld [vmem:[#allocation40_spill] sm:$0xff] }
 0x32e   :  { %1472 = vrot.lane.b32.xlu1 %v1444_v21, %s2367_s1  ;;  %v1844_v21 = vmul.f32 %v3528_v36, %v4312_v61 }
 0x331   :  { %1566 = vrot.lane.b32.xlu0 %v1531_v62, %s2368_s15  ;;  %v1397_v62 = vmax.f32 %v1381_v23, 0.0 }
 0x332   :  { %1552 = vrot.lane.b32.xlu1 %v1524_v45, %s2368_s15  ;;  %v4313_v45 = vld [vmem:[#allocation39_spill] sm:$0xff] }
 0x333   :  { %v3582_v37 = vmul.f32 %v1397_v62, %v4279_v46 }
 0x335   :  { %1646 = vrot.lane.b32.xlu0 %v1611_v3, %s2369_s16  ;;  %v1931_v3 = vmul.f32 %v3523_v48, %v4313_v45  ;;  %v1525_v46 = vmul.f32 %v3582_v37, %v4304_v22  ;;  %v1685_v62 = vmul.f32 %v3582_v37, %v4308_v31 }
 0x336   :  { %1632 = vrot.lane.b32.xlu1 %v1604_v39, %s2369_s16  ;;  %v3575_v39 = vmul.f32 %v1398_v54, %v4282_v12  ;;  %v1605_v54 = vmul.f32 %v3582_v37, %v4306_v28 }
 0x338   :  { %v1446_v1 = vmul.f32 %v3575_v39, %v4281_v56  ;;  %v1526_v23 = vmul.f32 %v3575_v39, %v4283_v41 }
 0x339   :  { %1726 = vrot.lane.b32.xlu0 %v1691_v58, %s2370_s17  ;;  %v4314_v58 = vld [vmem:[#allocation44_spill] sm:$0xff] }
 0x33a   :  { %1712 = vrot.lane.b32.xlu1 %v1684_v63, %s2370_s17  ;;  %v1924_v63 = vmul.f32 %v3528_v36, %v4314_v58 }
 0x33d   :  { %1806 = vrot.lane.b32.xlu0 %v1771_v42, %s2371_s18  ;;  %v4315_v42 = vld [vmem:[#allocation19_spill] sm:$0xff] }
 0x33e   :  { %1792 = vrot.lane.b32.xlu1 %v1764_v9, %s2371_s18  ;;  %v2011_v59 = vmul.f32 %v3523_v48, %v4315_v42  ;;  %v1445_v9 = vmul.f32 %v3582_v37, %v4302_v4 }
 0x341   :  { %1886 = vrot.lane.b32.xlu0 %v1851_v17, %s2372_s19  ;;  %v1606_v17 = vmul.f32 %v3575_v39, %v4285_v20 }
 0x342   :  { %1872 = vrot.lane.b32.xlu1 %v1844_v21, %s2372_s19  ;;  %v1686_v21 = vmul.f32 %v3575_v39, %v4287_v5 }
 0x345   :  { %1966 = vrot.lane.b32.xlu0 %v1931_v3, %s2373_s20  ;;  %v1766_v3 = vmul.f32 %v3575_v39, %v4289_v38 }
 0x346   :  { %1952 = vrot.lane.b32.xlu1 %v1924_v63, %s2373_s20  ;;  %v1336_v63 = vpop.f32.mrf.mxu1 }
 0x349   :  { %2046 = vrot.lane.b32.xlu0 %v2011_v59, %s2374_s25  ;;  %v1329_v59 = vadd.f32 %v3498_v52, %v4299_v51  ;;  %v1926_v52 = vmul.f32 %v3575_v39, %v4293_v8 }
 0x34a   :  { %1476 = vrot.lane.b32.xlu1 %v1446_v1, %s2367_s1  ;;  %v1765_v1 = vmul.f32 %v3582_v37, %v4310_v26 }
 0x34d   :  { %1474 = vrot.lane.b32.xlu0 %v1445_v9, %s2367_s1  ;;  %v1337_v9 = vadd.f32 %v1336_v63, %v4277_v7 }
 0x34e   :  { %1556 = vrot.lane.b32.xlu1 %v1526_v23, %s2368_s15  ;;  %v1846_v23 = vmul.f32 %v3575_v39, %v4291_v44 }
 0x351   :  { %1554 = vrot.lane.b32.xlu0 %v1525_v46, %s2368_s15  ;;  %v1395_v46 = vmax.f32 %v1329_v59, 0.0  ;;  %v2006_v59 = vmul.f32 %v3575_v39, %v4295_v27 }
 0x352   :  { %1636 = vrot.lane.b32.xlu1 %v1606_v17, %s2369_s16 }
 0x353   :  { %v3632_v7 = vmul.f32 %v1395_v46, %v4282_v12 }
 0x355   :  { %1634 = vrot.lane.b32.xlu0 %v1605_v54, %s2369_s16  ;;  %v1845_v54 = vmul.f32 %v3582_v37, %v4312_v61 }
 0x356   :  { %1716 = vrot.lane.b32.xlu1 %v1686_v21, %s2370_s17  ;;  %v1399_v21 = vmax.f32 %v1337_v9, 0.0  ;;  %v1443_v9 = vmul.f32 %v3632_v7, %v4302_v4 }
 0x359   :  { %1714 = vrot.lane.b32.xlu0 %v1685_v62, %s2370_s17  ;;  %v1925_v62 = vmul.f32 %v3582_v37, %v4314_v58 }
 0x35a   :  { %1796 = vrot.lane.b32.xlu1 %v1766_v3, %s2371_s18  ;;  %v3639_v3 = vmul.f32 %v1399_v21, %v4296_v10  ;;  %v1523_v21 = vmul.f32 %v3632_v7, %v4304_v22 }
 0x35c   :  { %v1447_v46 = vmul.f32 %v3639_v3, %v4281_v56  ;;  %v1603_v56 = vmul.f32 %v3632_v7, %v4306_v28  ;;  %v1687_v28 = vmul.f32 %v3639_v3, %v4287_v5 }
 0x35d   :  { %1794 = vrot.lane.b32.xlu0 %v1765_v1, %s2371_s18 }
 0x35e   :  { %1876 = vrot.lane.b32.xlu1 %v1846_v23, %s2372_s19 }
 0x35f   :  { %v3623_v17 = vpop.permute.xlu0 %1480 }
 0x361   :  { %1874 = vrot.lane.b32.xlu0 %v1845_v54, %s2372_s19 }
 0x362   :  { %1956 = vrot.lane.b32.xlu1 %v1926_v52, %s2373_s20 }
 0x363   :  { %v3634_v51 = vpop.permute.xlu0 %1560 }
 0x364   :  { %v1465_v63 = vpop.permute.xlu1 %1464 }
 0x365   :  { %1954 = vrot.lane.b32.xlu0 %v1925_v62, %s2373_s20  ;;  %v1527_v62 = vmul.f32 %v3639_v3, %v4283_v41  ;;  %v1683_v41 = vmul.f32 %v3632_v7, %v4308_v31  ;;  %v1767_v31 = vmul.f32 %v3639_v3, %v4289_v38  ;;  %v1418_v38 = vmul.f32 %v3465_v14, %v2814_v19 }
 0x366   :  { %2036 = vrot.lane.b32.xlu1 %v2006_v59, %s2374_s25 }
 0x367   :  { %v3645_v1 = vpop.permute.xlu0 %1640 }
 0x368   :  { %v1545_v23 = vpop.permute.xlu1 %1544 }
 0x369   :  { %1470 = vrot.lane.b32.xlu0 %v1443_v9, %s2367_s1  ;;  %v1607_v9 = vmul.f32 %v3639_v3, %v4285_v20 }
 0x36a   :  { %1478 = vrot.lane.b32.xlu1 %v1447_v46, %s2367_s1  ;;  %v1338_v46 = vpop.f32.mrf.mxu1 }
 0x36b   :  { %v3653_v54 = vpop.permute.xlu0 %1720  ;;  %v1339_v20 = vadd.f32 %v1338_v46, %v4298_v29  ;;  %v1843_v46 = vmul.f32 %v3632_v7, %v4312_v61  ;;  %v1923_v61 = vmul.f32 %v3632_v7, %v4314_v58 }
 0x36c   :  { %v3657_v52 = vpop.permute.xlu1 %1624 }
 0x36d   :  { %1550 = vrot.lane.b32.xlu0 %v1523_v21, %s2368_s15  ;;  %v1401_v5 = vmax.f32 %v1339_v20, 0.0 }
 0x36e   :  { %1558 = vrot.lane.b32.xlu1 %v1527_v62, %s2368_s15 }
 0x36f   :  { %v3663_v4 = vpop.permute.xlu0 %1800  ;;  %v3708_v20 = vmul.f32 %v1401_v5, %v4282_v12 }
 0x370   :  { %v3667_v59 = vpop.permute.xlu1 %1704 }
 0x371   :  { %1630 = vrot.lane.b32.xlu0 %v1603_v56, %s2369_s16  ;;  %v1763_v56 = vmul.f32 %v3632_v7, %v4310_v26  ;;  %v1847_v26 = vmul.f32 %v3639_v3, %v4291_v44 }
 0x372   :  { %1638 = vrot.lane.b32.xlu1 %v1607_v9, %s2369_s16  ;;  %v1340_v9 = vpop.f32.mrf.mxu1 }
 0x373   :  { %v3673_v22 = vpop.permute.xlu0 %1880 }
 0x374   :  { %v3677_v21 = vpop.permute.xlu1 %1784 }
 0x375   :  { %1710 = vrot.lane.b32.xlu0 %v1683_v41, %s2370_s17  ;;  %v1341_v41 = vadd.f32 %v1340_v9, %v4298_v29 }
 0x376   :  { %1718 = vrot.lane.b32.xlu1 %v1687_v28, %s2370_s17 }
 0x377   :  { %v3684_v62 = vpop.permute.xlu0 %1960  ;;  %v1402_v29 = vmax.f32 %v1341_v41, 0.0 }
 0x378   :  { %v3688_v57 = vpop.permute.xlu1 %1864 }
 0x379   :  { %1790 = vrot.lane.b32.xlu0 %v1763_v56, %s2371_s18 }
 0x37a   :  { %1798 = vrot.lane.b32.xlu1 %v1767_v31, %s2371_s18  ;;  %v1417_v31 = vmul.f32 %v3470_v6, %v2814_v19  ;;  %v1449_v6 = vmul.f32 %v3708_v20, %v4301_v13 }
 0x37b   :  { %v3695_v28 = vpop.permute.xlu0 %2040 }
 0x37c   :  { %v3699_v2 = vpop.permute.xlu1 %1944 }
 0x37d   :  { %1870 = vrot.lane.b32.xlu0 %v1843_v46, %s2372_s19  ;;  %v1416_v46 = vmul.f32 %v3424_v40, %v2814_v19 }
 0x37e   :  { %1878 = vrot.lane.b32.xlu1 %v1847_v26, %s2372_s19  ;;  %v1927_v26 = vmul.f32 %v3639_v3, %v4293_v8  ;;  %v2007_v8 = vmul.f32 %v3639_v3, %v4295_v27 }
 0x37f   :  { %v1469_v56 = vpop.permute.xlu0 %1468 }
 0x380   :  { %v1510_v9 = vadd.f32 %v1469_v56, %v1418_v38  ;;  %v1467_v44 = vpop.permute.xlu1 %1466  ;;  %v3725_v38 = vmul.f32 %v1402_v29, %v4296_v10  ;;  %v1529_v10 = vmul.f32 %v3708_v20, %v4303_v24 }
 0x381   :  { %v1488_v14 = vsel %vm378_vm2, %v1465_v63, %v1467_v44  ;;  %v1489_v12 = vsel %vm378_vm2, %v1467_v44, %v1469_v56  ;;  %1950 = vrot.lane.b32.xlu0 %v1923_v61, %s2373_s20 }
 0x382   :  { %v1508_v5 = vadd.f32 %v1488_v14, %v1416_v46  ;;  %v1509_v41 = vadd.f32 %v1489_v12, %v1417_v31  ;;  %1958 = vrot.lane.b32.xlu1 %v1927_v26, %s2373_s20  ;;  %v1450_v46 = vmul.f32 %v3725_v38, %v4301_v13  ;;  %v1609_v12 = vmul.f32 %v3708_v20, %v4305_v49 }
 0x383   :  { %v1549_v58 = vpop.permute.xlu0 %1548  ;;  %v1530_v13 = vmul.f32 %v3725_v38, %v4303_v24  ;;  %v1610_v24 = vmul.f32 %v3725_v38, %v4305_v49  ;;  %v1690_v49 = vmul.f32 %v3725_v38, %v4307_v32 }
 0x384   :  { %v1590_v19 = vadd.f32 %v1549_v58, %v1510_v9  ;;  %v1547_v60 = vpop.permute.xlu1 %1546 }
 0x385   :  { %v1568_v63 = vsel %vm475_vm3, %v1545_v23, %v1547_v60  ;;  %v1569_v56 = vsel %vm475_vm3, %v1547_v60, %v1549_v58  ;;  %1482 = vrot.lane.b32.xlu0 %v1449_v6, %s2367_s1 }
 0x386   :  { %v1588_v61 = vadd.f32 %v1568_v63, %v1508_v5  ;;  %v1589_v31 = vadd.f32 %v1569_v56, %v1509_v41  ;;  %2038 = vrot.lane.b32.xlu1 %v2007_v8, %s2374_s25  ;;  %v1689_v63 = vmul.f32 %v3708_v20, %v4307_v32  ;;  %v1770_v32 = vmul.f32 %v3725_v38, %v4309_v35 }
 0x387   :  { %v1629_v44 = vpop.permute.xlu0 %1628 }
 0x388   :  { %v1670_v29 = vadd.f32 %v1629_v44, %v1590_v19  ;;  %v1627_v9 = vpop.permute.xlu1 %1626 }
 0x389   :  { %v1648_v27 = vsel %vm572_vm4, %v3657_v52, %v1627_v9  ;;  %v1649_v60 = vsel %vm572_vm4, %v1627_v9, %v1629_v44  ;;  %1562 = vrot.lane.b32.xlu0 %v1529_v10, %s2368_s15  ;;  %v1769_v9 = vmul.f32 %v3708_v20, %v4309_v35 }
 0x38a   :  { %v1668_v23 = vadd.f32 %v1648_v27, %v1588_v61  ;;  %v1669_v26 = vadd.f32 %v1649_v60, %v1589_v31  ;;  %1484 = vrot.lane.b32.xlu1 %v1450_v46, %s2367_s1 }
 0x38b   :  { %v1709_v14 = vpop.permute.xlu0 %1708 }
 0x38c   :  { %v1750_v5 = vadd.f32 %v1709_v14, %v1670_v29  ;;  %v1707_v41 = vpop.permute.xlu1 %1706 }
 0x38d   :  { %v1728_v52 = vsel %vm669_vm5, %v3667_v59, %v1707_v41  ;;  %v1729_v58 = vsel %vm669_vm5, %v1707_v41, %v1709_v14  ;;  %1642 = vrot.lane.b32.xlu0 %v1609_v12, %s2369_s16  ;;  %v1849_v12 = vmul.f32 %v3708_v20, %v4311_v30 }
 0x38e   :  { %v1748_v6 = vadd.f32 %v1728_v52, %v1668_v23  ;;  %v1749_v19 = vadd.f32 %v1729_v58, %v1669_v26  ;;  %1564 = vrot.lane.b32.xlu1 %v1530_v13, %s2368_s15 }
 0x38f   :  { %v1789_v8 = vpop.permute.xlu0 %1788 }
 0x390   :  { %v1830_v56 = vadd.f32 %v1789_v8, %v1750_v5  ;;  %v1787_v61 = vpop.permute.xlu1 %1786 }
 0x391   :  { %v1808_v59 = vsel %vm766_vm6, %v3677_v21, %v1787_v61  ;;  %v1809_v31 = vsel %vm766_vm6, %v1787_v61, %v1789_v8  ;;  %1722 = vrot.lane.b32.xlu0 %v1689_v63, %s2370_s17 }
 0x392   :  { %v1828_v44 = vadd.f32 %v1808_v59, %v1748_v6  ;;  %v1829_v10 = vadd.f32 %v1809_v31, %v1749_v19  ;;  %1644 = vrot.lane.b32.xlu1 %v1610_v24, %s2369_s16  ;;  %v1929_v19 = vmul.f32 %v3708_v20, %v4313_v45  ;;  %v2009_v24 = vmul.f32 %v3708_v20, %v4315_v42 }
 0x393   :  { %v1869_v29 = vpop.permute.xlu0 %1868  ;;  %v1930_v31 = vmul.f32 %v3725_v38, %v4313_v45 }
 0x394   :  { %v1910_v46 = vadd.f32 %v1869_v29, %v1830_v56  ;;  %v1867_v27 = vpop.permute.xlu1 %1866 }
 0x395   :  { %v1888_v21 = vsel %vm863_vm7, %v3688_v57, %v1867_v27  ;;  %v1889_v60 = vsel %vm863_vm7, %v1867_v27, %v1869_v29  ;;  %1802 = vrot.lane.b32.xlu0 %v1769_v9, %s2371_s18  ;;  %v2010_v9 = vmul.f32 %v3725_v38, %v4315_v42  ;;  %v1424_v27 = vmul.f32 %v3417_v50, %v2805_v16 }
 0x396   :  { %v1908_v23 = vadd.f32 %v1888_v21, %v1828_v44  ;;  %v1909_v26 = vadd.f32 %v1889_v60, %v1829_v10  ;;  %1724 = vrot.lane.b32.xlu1 %v1690_v49, %s2370_s17  ;;  %v4316_v44 = vld [vmem:[#allocation45_spill] sm:$0xff]  ;;  %v50_v60 = vld [vmem:[%s4055_s7 + $0x8] sm:$0xff]  ;;  %v1427_v50 = vmul.f32 %v3523_v48, %v2802_v15 }
 0x397   :  { %v1949_v14 = vpop.permute.xlu0 %1948  ;;  %v2005_v10 = vmul.f32 %v3582_v37, %v4316_v44  ;;  %v2003_v45 = vmul.f32 %v3632_v7, %v4316_v44  ;;  %v2004_v21 = vmul.f32 %v3528_v36, %v4316_v44  ;;  %v1516_v42 = vadd.f32 %v3623_v17, %v1424_v27 }
 0x398   :  { %v1990_v5 = vadd.f32 %v1949_v14, %v1910_v46  ;;  %v1947_v41 = vpop.permute.xlu1 %1946 }
 0x399   :  { %v1968_v57 = vsel %vm960_vm8, %v3699_v2, %v1947_v41  ;;  %v1969_v13 = vsel %vm960_vm8, %v1947_v41, %v1949_v14  ;;  %1882 = vrot.lane.b32.xlu0 %v1849_v12, %s2372_s19  ;;  %v1850_v2 = vmul.f32 %v3725_v38, %v4311_v30  ;;  %v2000_v12 = vmul.f32 %v3424_v40, %v4300_v11 }
 0x39a   :  { %v3777_v52 = vadd.f32 %v1968_v57, %v1908_v23  ;;  %v1989_v58 = vadd.f32 %v1969_v13, %v1909_v26  ;;  %1804 = vrot.lane.b32.xlu1 %v1770_v32, %s2371_s18  ;;  %v1596_v26 = vadd.f32 %v3634_v51, %v1516_v42  ;;  %v49_v57 = vld [vmem:[%s4055_s7] sm:$0xff] }
 0x39b   :  { %v2029_v6 = vpop.permute.xlu0 %2028 }
 0x39c   :  { %v3782_v8 = vadd.f32 %v2029_v6, %v1990_v5  ;;  %v3784_v63 = vpop.permute.xlu1 %2026  ;;  %v1676_v5 = vadd.f32 %v3645_v1, %v1596_v26 }
 0x39d   :  { %v2049_v35 = vsel %vm1057_vm9, %v3784_v63, %v2029_v6  ;;  %1962 = vrot.lane.b32.xlu0 %v1929_v19, %s2373_s20 }
 0x39e   :  { %v3791_v56 = vadd.f32 %v2049_v35, %v1989_v58  ;;  %1884 = vrot.lane.b32.xlu1 %v1850_v2, %s2372_s19  ;;  %v1756_v48 = vadd.f32 %v3653_v54, %v1676_v5 }
 0x39f   :  { %v3794_v61 = vpop.permute.xlu0 %1486 }
 0x3a0   :  { %v3798_v59 = vpop.permute.xlu1 %1472  ;;  %v1519_v41 = vadd.f32 %v3794_v61, %v1427_v50  ;;  %v1836_v40 = vadd.f32 %v3663_v4, %v1756_v48 }
 0x3a1   :  { %2042 = vrot.lane.b32.xlu0 %v2009_v24, %s2374_s25 }
 0x3a2   :  { %1964 = vrot.lane.b32.xlu1 %v1930_v31, %s2373_s20  ;;  %v1916_v19 = vadd.f32 %v3673_v22, %v1836_v40 }
 0x3a3   :  { %v3804_v30 = vpop.permute.xlu0 %1566 }
 0x3a4   :  { %v3808_v29 = vpop.permute.xlu1 %1552  ;;  %v1599_v13 = vadd.f32 %v3804_v30, %v1519_v41  ;;  %v1996_v24 = vadd.f32 %v3684_v62, %v1916_v19  ;;  %v1420_v41 = vmul.f32 %v3528_v36, %v4247_v25 }
 0x3a5   :  { %2034 = vrot.lane.b32.xlu0 %v2005_v10, %s2374_s25 }
 0x3a6   :  { %2044 = vrot.lane.b32.xlu1 %v2010_v9, %s2374_s25  ;;  %v2076_v10 = vadd.f32 %v3695_v28, %v1996_v24 }
 0x3a7   :  { %v3814_v46 = vpop.permute.xlu0 %1646 }
 0x3a8   :  { %v3820_v49 = vpop.permute.xlu1 %1632  ;;  %v1679_v11 = vadd.f32 %v3814_v46, %v1599_v13  ;;  %v2088_v42 = vadd.f32 %v2076_v10, %v3089_v47 }
 0x3a9   :  { %2030 = vrot.lane.b32.xlu0 %v2003_v45, %s2374_s25 }
 0x3aa   :  { %2032 = vrot.lane.b32.xlu1 %v2004_v21, %s2374_s25 }
 0x3ab   :  { %v3830_v23 = vpop.permute.xlu0 %1726 }
 0x3ac   :  { %v3835_v14 = vpop.permute.xlu1 %1712  ;;  %v1759_v2 = vadd.f32 %v3830_v23, %v1679_v11 }
 0x3ad   :  { %1147 = vperm.xlu0 %2333, %v50_v60  }
 0x3ae   :  { %2024 = vrot.lane.b32.xlu1 %v2000_v12, %s2374_s25  ;;  %v1421_v12 = vmul.f32 %v3582_v37, %v4247_v25 }
 0x3af   :  { %v3842_v32 = vpop.permute.xlu0 %1806 }
 0x3b0   :  { %v3849_v58 = vpop.permute.xlu1 %1792  ;;  %v1839_v31 = vadd.f32 %v3842_v32, %v1759_v2 }
 0x3b2   :  { %1142 = vperm.xlu1 %2335, %v49_v57   ;;  %v2100_v57 = vmax.f32 %v2088_v42, 0.0 }
 0x3b3   :  { %v3853_v6 = vpop.permute.xlu0 %1886 }
 0x3b4   :  { %v3857_v35 = vpop.permute.xlu1 %1872  ;;  %v1919_v9 = vadd.f32 %v3853_v6, %v1839_v31 }
 0x3b7   :  { %v3861_v44 = vpop.permute.xlu0 %1966 }
 0x3b8   :  { %v3865_v45 = vpop.permute.xlu1 %1952  ;;  %v1999_v27 = vadd.f32 %v3861_v44, %v1919_v9 }
 0x3bb   :  { %v3868_v21 = vpop.permute.xlu0 %2046 }
 0x3bc   :  { %v2079_v60 = vadd.f32 %v3868_v21, %v1999_v27  ;;  %v1477_v26 = vpop.permute.xlu1 %1476 }
 0x3be   :  { %v2091_v50 = vadd.f32 %v2079_v60, %v3091_v53 }
 0x3bf   :  { %v1475_v5 = vpop.permute.xlu0 %1474 }
 0x3c0   :  { %v2103_v48 = vmax.f32 %v2091_v50, 0.0  ;;  %v1491_v13 = vsel %vm378_vm2, %v3798_v59, %v1475_v5  ;;  %v1513_v40 = vadd.f32 %v1475_v5, %v1421_v12  ;;  %v1557_v11 = vpop.permute.xlu1 %1556 }
 0x3c1   :  { %v1512_v19 = vadd.f32 %v1491_v13, %v1420_v41 }
 0x3c2   :  { %v2109_v2 = vpack.c.bf16 %v2103_v48, %v2100_v57 }
 0x3c3   :  { %v1555_v24 = vpop.permute.xlu0 %1554 }
 0x3c4   :  { %v1571_v31 = vsel %vm475_vm3, %v3808_v29, %v1555_v24  ;;  %v1593_v10 = vadd.f32 %v1555_v24, %v1513_v40  ;;  %2285 = vmatpush3.bf16.msra.mxu1 %v2109_v2  ;;  %v1637_v37 = vpop.permute.xlu1 %1636 }
 0x3c5   :  { %v1592_v9 = vadd.f32 %v1571_v31, %v1512_v19  ;;  %2286 = vmatprep.subr.bf16.mxu1 %v4231_v43 }
 0x3c7   :  { %v1635_v36 = vpop.permute.xlu0 %1634 }
 0x3c8   :  { %v1651_v27 = vsel %vm572_vm4, %v3820_v49, %v1635_v36  ;;  %v1673_v42 = vadd.f32 %v1635_v36, %v1593_v10  ;;  %v1717_v60 = vpop.permute.xlu1 %1716 }
 0x3c9   :  { %v1672_v50 = vadd.f32 %v1651_v27, %v1592_v9 }
 0x3cb   :  { %v1715_v12 = vpop.permute.xlu0 %1714 }
 0x3cc   :  { %v1731_v5 = vsel %vm669_vm5, %v3835_v14, %v1715_v12  ;;  %v1753_v41 = vadd.f32 %v1715_v12, %v1673_v42  ;;  %v1797_v57 = vpop.permute.xlu1 %1796 }
 0x3cd   :  { %v1752_v48 = vadd.f32 %v1731_v5, %v1672_v50 }
 0x3cf   :  { %v1795_v13 = vpop.permute.xlu0 %1794 }
 0x3d0   :  { %v1811_v40 = vsel %vm766_vm6, %v3849_v58, %v1795_v13  ;;  %v1833_v19 = vadd.f32 %v1795_v13, %v1753_v41  ;;  %v1877_v43 = vpop.permute.xlu1 %1876  ;;  %v1419_v41 = vmul.f32 %v3632_v7, %v4247_v25  ;;  %v1422_v13 = vmul.f32 %v3575_v39, %v2805_v16 }
 0x3d1   :  { %v1832_v2 = vadd.f32 %v1811_v40, %v1752_v48 }
 0x3d3   :  { %v1875_v24 = vpop.permute.xlu0 %1874 }
 0x3d4   :  { %v1891_v31 = vsel %vm863_vm7, %v3857_v35, %v1875_v24  ;;  %v3890_v10 = vadd.f32 %v1875_v24, %v1833_v19  ;;  %v1957_v9 = vpop.permute.xlu1 %1956 }
 0x3d5   :  { %v1912_v36 = vadd.f32 %v1891_v31, %v1832_v2 }
 0x3d7   :  { %v3892_v27 = vpop.permute.xlu0 %1954 }
 0x3d8   :  { %v1971_v42 = vsel %vm960_vm8, %v3865_v45, %v3892_v27  ;;  %v2037_v50 = vpop.permute.xlu1 %2036 }
 0x3d9   :  { %v3897_v12 = vadd.f32 %v1971_v42, %v1912_v36 }
 0x3db   :  { %v1471_v5 = vpop.permute.xlu0 %1470 }
 0x3dc   :  { %v1490_v48 = vsel %vm378_vm2, %v1471_v5, %v3798_v59  ;;  %v1479_v40 = vpop.permute.xlu1 %1478 }
 0x3dd   :  { %v1511_v19 = vadd.f32 %v1490_v48, %v1419_v41  ;;  %v1492_v2 = vsel %vm378_vm2, %v1477_v26, %v1479_v40 }
 0x3de   :  { %v1514_v24 = vadd.f32 %v1492_v2, %v1422_v13 }
 0x3df   :  { %v1551_v31 = vpop.permute.xlu0 %1550 }
 0x3e0   :  { %v1570_v36 = vsel %vm475_vm3, %v1551_v31, %v3808_v29  ;;  %v1559_v42 = vpop.permute.xlu1 %1558 }
 0x3e1   :  { %v1591_v34 = vadd.f32 %v1570_v36, %v1511_v19  ;;  %v1572_v18 = vsel %vm475_vm3, %v1557_v11, %v1559_v42 }
 0x3e2   :  { %v1594_v25 = vadd.f32 %v1572_v18, %v1514_v24 }
 0x3e3   :  { %v1631_v7 = vpop.permute.xlu0 %1630 }
 0x3e4   :  { %v1650_v59 = vsel %vm572_vm4, %v1631_v7, %v3820_v49  ;;  %v1639_v5 = vpop.permute.xlu1 %1638 }
 0x3e5   :  { %v1671_v39 = vadd.f32 %v1650_v59, %v1591_v34  ;;  %v1652_v41 = vsel %vm572_vm4, %v1637_v37, %v1639_v5 }
 0x3e6   :  { %v1674_v48 = vadd.f32 %v1652_v41, %v1594_v25 }
 0x3e7   :  { %v1711_v26 = vpop.permute.xlu0 %1710 }
 0x3e8   :  { %v1730_v13 = vsel %vm669_vm5, %v1711_v26, %v3835_v14  ;;  %v1719_v2 = vpop.permute.xlu1 %1718 }
 0x3e9   :  { %v1751_v29 = vadd.f32 %v1730_v13, %v1671_v39  ;;  %v1732_v19 = vsel %vm669_vm5, %v1717_v60, %v1719_v2 }
 0x3ea   :  { %v1754_v31 = vadd.f32 %v1732_v19, %v1674_v48 }
 0x3eb   :  { %v1791_v11 = vpop.permute.xlu0 %1790 }
 0x3ec   :  { %v1810_v18 = vsel %vm766_vm6, %v1791_v11, %v3849_v58  ;;  %v1799_v24 = vpop.permute.xlu1 %1798 }
 0x3ed   :  { %v1831_v49 = vadd.f32 %v1810_v18, %v1751_v29  ;;  %v1812_v34 = vsel %vm766_vm6, %v1797_v57, %v1799_v24 }
 0x3ee   :  { %v1834_v36 = vadd.f32 %v1812_v34, %v1754_v31 }
 0x3ef   :  { %v1871_v37 = vpop.permute.xlu0 %1870 }
 0x3f0   :  { %v1890_v25 = vsel %vm863_vm7, %v1871_v37, %v3857_v35  ;;  %v1879_v7 = vpop.permute.xlu1 %1878 }
 0x3f1   :  { %v1911_v14 = vadd.f32 %v1890_v25, %v1831_v49  ;;  %v1892_v59 = vsel %vm863_vm7, %v1877_v43, %v1879_v7 }
 0x3f2   :  { %v1914_v39 = vadd.f32 %v1892_v59, %v1834_v36  ;;  %v1423_v36 = vmul.f32 %v3639_v3, %v2805_v16  ;;  %v1425_v16 = vmul.f32 %v3708_v20, %v2802_v15 }
 0x3f3   :  { %v1951_v60 = vpop.permute.xlu0 %1950 }
 0x3f4   :  { %v1970_v41 = vsel %vm960_vm8, %v1951_v60, %v3865_v45  ;;  %v1959_v48 = vpop.permute.xlu1 %1958  ;;  %v1493_v45 = vsel %vm378_vm2, %v1479_v40, %v3623_v17  ;;  %v1733_v17 = vsel %vm669_vm5, %v1719_v2, %v3653_v54 }
 0x3f5   :  { %v3923_v58 = vadd.f32 %v1970_v41, %v1911_v14  ;;  %v1972_v26 = vsel %vm960_vm8, %v1957_v9, %v1959_v48  ;;  %v1573_v9 = vsel %vm475_vm3, %v1559_v42, %v3634_v51  ;;  %v1515_v37 = vadd.f32 %v1493_v45, %v1423_v36 }
 0x3f6   :  { %v1994_v57 = vadd.f32 %v1972_v26, %v1914_v39  ;;  %v1426_v51 = vmul.f32 %v3725_v38, %v2802_v15  ;;  %v1893_v15 = vsel %vm863_vm7, %v1879_v7, %v3673_v22 }
 0x3f7   :  { %v1483_v13 = vpop.permute.xlu0 %1482  ;;  %v1595_v59 = vadd.f32 %v1573_v9, %v1515_v37 }
 0x3f8   :  { %v2039_v29 = vpop.permute.xlu1 %2038 }
 0x3f9   :  { %v2052_v19 = vsel %vm1057_vm9, %v2037_v50, %v2039_v29  ;;  %v1653_v50 = vsel %vm572_vm4, %v1639_v5, %v3645_v1  ;;  %v1813_v5 = vsel %vm766_vm6, %v1799_v24, %v3663_v4  ;;  %v2053_v7 = vsel %vm1057_vm9, %v2039_v29, %v3695_v28 }
 0x3fa   :  { %v3927_v35 = vadd.f32 %v2052_v19, %v1994_v57  ;;  %v1675_v3 = vadd.f32 %v1653_v50, %v1595_v59  ;;  %v1973_v19 = vsel %vm960_vm8, %v1959_v48, %v3684_v62  ;;  %v1993_v28 = vadd.f32 %v3892_v27, %v3890_v10 }
 0x3fb   :  { %v1563_v31 = vpop.permute.xlu0 %1562 }
 0x3fc   :  { %v1485_v11 = vpop.permute.xlu1 %1484  ;;  %v1755_v54 = vadd.f32 %v1733_v17, %v1675_v3 }
 0x3fd   :  { %v1494_v39 = vsel %vm378_vm2, %v1483_v13, %v1485_v11  ;;  %v1495_v60 = vsel %vm378_vm2, %v1485_v11, %v3794_v61 }
 0x3fe   :  { %v1517_v61 = vadd.f32 %v1494_v39, %v1425_v16  ;;  %v1518_v41 = vadd.f32 %v1495_v60, %v1426_v51  ;;  %v1835_v13 = vadd.f32 %v1813_v5, %v1755_v54  ;;  %v2082_v39 = vadd.f32 %v3782_v8, %v3288_v55 }
 0x3ff   :  { %v1643_v43 = vpop.permute.xlu0 %1642  ;;  %v2086_v51 = vadd.f32 %v3927_v35, %v3089_v47 }
 0x400   :  { %v1565_v18 = vpop.permute.xlu1 %1564  ;;  %v2094_v8 = vmax.f32 %v2082_v39, 0.0 }
 0x401   :  { %v1574_v40 = vsel %vm475_vm3, %v1563_v31, %v1565_v18  ;;  %v1575_v1 = vsel %vm475_vm3, %v1565_v18, %v3804_v30  ;;  %v1915_v18 = vadd.f32 %v1893_v15, %v1835_v13  ;;  %v2098_v35 = vmax.f32 %v2086_v51, 0.0 }
 0x402   :  { %v1597_v38 = vadd.f32 %v1574_v40, %v1517_v61  ;;  %v1598_v57 = vadd.f32 %v1575_v1, %v1518_v41 }
 0x403   :  { %v1723_v49 = vpop.permute.xlu0 %1722 }
 0x404   :  { %v1645_v34 = vpop.permute.xlu1 %1644 }
 0x405   :  { %v1654_v2 = vsel %vm572_vm4, %v1643_v43, %v1645_v34  ;;  %v1655_v20 = vsel %vm572_vm4, %v1645_v34, %v3814_v46  ;;  %v1995_v34 = vadd.f32 %v1973_v19, %v1915_v18 }
 0x406   :  { %v1677_v31 = vadd.f32 %v1654_v2, %v1597_v38  ;;  %v1678_v11 = vadd.f32 %v1655_v20, %v1598_v57  ;;  %v2081_v57 = vadd.f32 %v3791_v56, %v3288_v55  ;;  %v2357_v56 = vld [vmem:[%s4054_s6] sm:$0xff]  }
 0x407   :  { %v1803_v25 = vpop.permute.xlu0 %1802  ;;  %v2075_v50 = vadd.f32 %v2053_v7, %v1995_v34  ;;  %v4317_v7 = vld [vmem:[#allocation30_spill] sm:$0xff] }
 0x408   :  { %v1725_v14 = vpop.permute.xlu1 %1724 }
 0x409   :  { %v1734_v30 = vsel %vm669_vm5, %v1723_v49, %v1725_v14  ;;  %v1735_v4 = vsel %vm669_vm5, %v1725_v14, %v3830_v23  ;;  %v2087_v3 = vadd.f32 %v2075_v50, %v3089_v47 }
 0x40a   :  { %v1757_v49 = vadd.f32 %v1734_v30, %v1677_v31  ;;  %v1758_v45 = vadd.f32 %v1735_v4, %v1678_v11 }
 0x40b   :  { %v1883_v42 = vpop.permute.xlu0 %1882  ;;  %v2099_v54 = vmax.f32 %v2087_v3, 0.0 }
 0x40c   :  { %v1805_v26 = vpop.permute.xlu1 %1804 }
 0x40d   :  { %v1814_v46 = vsel %vm766_vm6, %v1803_v25, %v1805_v26  ;;  %v1815_v22 = vsel %vm766_vm6, %v1805_v26, %v3842_v32 }
 0x40e   :  { %v1837_v36 = vadd.f32 %v1814_v46, %v1757_v49  ;;  %v1838_v9 = vadd.f32 %v1815_v22, %v1758_v45  ;;  %v4318_v45 = vld [vmem:[#allocation47_spill] sm:$0xff] }
 0x40f   :  { %v1963_v24 = vpop.permute.xlu0 %1962 }
 0x410   :  { %v1885_v43 = vpop.permute.xlu1 %1884 }
 0x411   :  { %v1894_v23 = vsel %vm863_vm7, %v1883_v42, %v1885_v43  ;;  %v1895_v62 = vsel %vm863_vm7, %v1885_v43, %v3853_v6 }
 0x412   :  { %v1917_v29 = vadd.f32 %v1894_v23, %v1837_v36  ;;  %v1918_v14 = vadd.f32 %v1895_v62, %v1838_v9  ;;  %v4320_v62 = vld [vmem:[#allocation52_spill] sm:$0xff]  ;;  %v4321_v36 = vld [vmem:[#allocation50_spill] sm:$0xff] }
 0x413   :  { %v2043_v48 = vpop.permute.xlu0 %2042 }
 0x414   :  { %v1965_v37 = vpop.permute.xlu1 %1964 }
 0x415   :  { %v1974_v25 = vsel %vm960_vm8, %v1963_v24, %v1965_v37  ;;  %v1975_v32 = vsel %vm960_vm8, %v1965_v37, %v3861_v44 }
 0x416   :  { %v1997_v6 = vadd.f32 %v1974_v25, %v1917_v29  ;;  %v1998_v60 = vadd.f32 %v1975_v32, %v1918_v14 }
 0x417   :  { %v2035_v59 = vpop.permute.xlu0 %2034 }
 0x418   :  { %v2073_v17 = vadd.f32 %v2035_v59, %v1993_v28  ;;  %v2045_v16 = vpop.permute.xlu1 %2044 }
 0x419   :  { %v2054_v44 = vsel %vm1057_vm9, %v2043_v48, %v2045_v16  ;;  %v2055_v10 = vsel %vm1057_vm9, %v2045_v16, %v3868_v21 }
 0x41a   :  { %v2085_v27 = vadd.f32 %v2073_v17, %v3294_v33  ;;  %v2077_v40 = vadd.f32 %v2054_v44, %v1997_v6  ;;  %v2078_v1 = vadd.f32 %v2055_v10, %v1998_v60 }
 0x41b   :  { %v2031_v42 = vpop.permute.xlu0 %2030 }
 0x41c   :  { %v2097_v5 = vmax.f32 %v2085_v27, 0.0  ;;  %v2089_v61 = vadd.f32 %v2077_v40, %v3091_v53  ;;  %v2090_v41 = vadd.f32 %v2078_v1, %v3091_v53  ;;  %v2033_v26 = vpop.permute.xlu1 %2032 }
 0x41d   :  { %v2050_v47 = vsel %vm1057_vm9, %v2031_v42, %v2033_v26  ;;  %v2051_v2 = vsel %vm1057_vm9, %v2033_v26, %v2035_v59 }
 0x41e   :  { %v2106_v20 = vpack.c.bf16 %v2097_v5, %v2094_v8  ;;  %v2101_v21 = vmax.f32 %v2089_v61, 0.0  ;;  %v2102_v15 = vmax.f32 %v2090_v41, 0.0  ;;  %v2071_v38 = vadd.f32 %v2050_v47, %v3923_v58 }
 0x41f   :  { %v2072_v13 = vadd.f32 %v2051_v2, %v3897_v12  ;;  %v2093_v58 = vmax.f32 %v2081_v57, 0.0 }
 0x420   :  { %v2107_v30 = vpack.c.bf16 %v2101_v21, %v2098_v35  ;;  %2287 = vmatpush3.bf16.msra.mxu1 %v2106_v20  ;;  %v2025_v53 = vpop.permute.xlu1 %2024  ;;  %v2108_v4 = vpack.c.bf16 %v2102_v15, %v2099_v54  ;;  %v2083_v31 = vadd.f32 %v2071_v38, %v3294_v33 }
 0x421   :  { %v2084_v24 = vadd.f32 %v2072_v13, %v3294_v33  ;;  %v2048_v19 = vsel %vm1057_vm9, %v2025_v53, %v3784_v63 }
 0x422   :  { %v2068_v11 = vadd.f32 %v2048_v19, %v3777_v52  ;;  %2122 = vmatprep.subr.bf16.mxu0 %v2108_v4  ;;  %v2095_v46 = vmax.f32 %v2083_v31, 0.0 }
 0x423   :  { %v2096_v43 = vmax.f32 %v2084_v24, 0.0  ;;  %2123 = vmatpush1.bf16.msra.mxu0 %v2107_v30  ;;  %2289 = vmatmul.mubr.msk.bf16.vlgmr.msra.gmra.mxu1 %vm121_vm0, %v2357_v56 }
 0x424   :  { %v2080_v12 = vadd.f32 %v2068_v11, %v3288_v55 }
 0x425   :  { %v2105_v18 = vpack.c.bf16 %v2096_v43, %v2093_v58 }
 0x426   :  { %v2092_v22 = vmax.f32 %v2080_v12, 0.0 }
 0x427   :  { %2124 = vmatprep.subr.bf16.mxu0 %v2105_v18 }
 0x428   :  { %v2104_v63 = vpack.c.bf16 %v2095_v46, %v2092_v22  ;;  %v1148_v33 = vpop.permute.xlu0 %1147 }
 0x429   :  { %v1197_v52 = vadd.f32 %v3412_v0, %v1148_v33  ;;  %v1199_v49 = vadd.f32 %v4317_v7, %v1148_v33  ;;  %v1239_v34 = vadd.f32 %v4318_v45, %v1148_v33  ;;  %v4319_v0 = vld [vmem:[#allocation32_spill] sm:$0xff] }
 0x42a   :  { %2125 = vmatpush1.bf16.msra.mxu0 %v2104_v63 }
 0x42b   :  { %1246 = vst [vmem:[%s4056_s8 + $0x18] sm:$0xff] %v1197_v52  ;;  %1247 = vst [vmem:[%s4056_s8 + $0x20] sm:$0xff] %v1199_v49 }
 0x42c   :  { %1248 = vst.msk [vmem:[%s4056_s8 + $0x28] sm:$0xff] %vm1244_vm10, %v1239_v34 }
 0x42d   :  { %v1143_v55 = vpop.permute.xlu1 %1142  ;;  %2238 = vmatmul.mubr.msk.bf16.vlgmr.msra.gmra.mxu0 %vm121_vm0, %v2357_v56 }
 0x42e   :  { %v1193_v23 = vadd.f32 %v4319_v0, %v1143_v55  ;;  %v1195_v48 = vadd.f32 %v4320_v62, %v1143_v55  ;;  %v1236_v9 = vadd.f32 %v4321_v36, %v1143_v55 }
 0x430   :  { %1242 = vst [vmem:[%s4056_s8] sm:$0xff] %v1193_v23  ;;  %1243 = vst [vmem:[%s4056_s8 + $0x8] sm:$0xff] %v1195_v48 }
 0x431   :  { %1245 = vst.msk [vmem:[%s4056_s8 + $0x10] sm:$0xff] %vm1244_vm10, %v1236_v9 }
 0x4e3   :  { %v2187_v37 = vpop.f32.mrf.mxu1 }
 0x4e4   :  { %v2188_v50 = vadd.f32 %v2187_v37, %v1143_v55 }
 0x4e5   :  { %v2290_v25 = vpop.f32.mrf.mxu1 }
 0x4e6   :  { %2242 = vst.msk [vmem:[%s4056_s8 + $0x40] sm:$0xff] %vm1244_vm10, %v2188_v50 }
 0x4e7   :  { %v2190_v32 = vpop.f32.mrf.mxu1 }
 0x4e8   :  { %v2191_v28 = vadd.f32 %v2190_v32, %v1148_v33 }
 0x4e9   :  { %v2291_v29 = vpop.f32.mrf.mxu1 }
 0x4ea   :  { %2245 = vst.msk [vmem:[%s4056_s8 + $0x58] sm:$0xff] %vm1244_vm10, %v2191_v28 }
 0x4ed   :  { %v2144_v14 = vpop.f32.mrf.mxu0 }
 0x4ee   :  { %v2145_v59 = vadd.f32 %v2144_v14, %v1143_v55 }
 0x4ef   :  { %v2146_v39 = vpop.f32.mrf.mxu0 }
 0x4f0   :  { %2240 = vst [vmem:[%s4056_s8 + $0x30] sm:$0xff] %v2145_v59  ;;  %v2147_v6 = vadd.f32 %v2146_v39, %v1143_v55 }
 0x4f1   :  { %v2148_v60 = vpop.f32.mrf.mxu0 }
 0x4f2   :  { %2241 = vst [vmem:[%s4056_s8 + $0x38] sm:$0xff] %v2147_v6  ;;  %v2149_v17 = vadd.f32 %v2148_v60, %v1148_v33 }
 0x4f3   :  { %v2150_v16 = vpop.f32.mrf.mxu0 }
 0x4f4   :  { %2243 = vst [vmem:[%s4056_s8 + $0x48] sm:$0xff] %v2149_v17  ;;  %v2151_v51 = vadd.f32 %v2150_v16, %v1148_v33 }
 0x4f6   :  { %2244 = vst [vmem:[%s4056_s8 + $0x50] sm:$0xff] %v2151_v51 }

</bundles_post_ra>
